<compile_context>
chip_gen: v7x
topology: tpu7x:2x2x1
jax: 0.10.0
libtpu: 0.0.40
codegen_flags: <defaults>
</compile_context>

<pallas_src>
import functools
import math

import numpy as np
import jax
import jax.numpy as jnp
from jax import lax
from jax.experimental import pallas as pl
from jax.experimental.pallas import tpu as pltpu

_NEG = -1e30

# Rows of the (N_ACC, TM, 1) f32 accumulator scratch.
_EXP_V2T, _MAT_V2T, _RMAX_V2T, _MMAX_V2T = 0, 1, 2, 3
_EXP_T2V, _MAT_T2V, _RMAX_T2V, _MMAX_T2V = 4, 5, 6, 7
_EXP_VI, _MAT_VI = 8, 9
_EXP_TI, _MAT_TI = 10, 11
_NMATCH, _NOFF = 12, 13
_N_ACC = 14


def _dcl_kernel(rid_ref, cid_ref, vrow_ref, trow_ref, vcolT_ref, tcolT_ref,
                o_ref, acc_ref, *, tile_m, tile_k, b_real):
    k = pl.program_id(1)
    row0 = pl.program_id(0) * tile_m
    col0 = k * tile_k

    @pl.when(k == 0)
    def _init():
        acc_ref[...] = jnp.zeros_like(acc_ref)
        neg = jnp.full((tile_m, 1), _NEG, jnp.float32)
        acc_ref[_RMAX_V2T] = neg
        acc_ref[_MMAX_V2T] = neg
        acc_ref[_RMAX_T2V] = neg
        acc_ref[_MMAX_T2V] = neg

    rid = rid_ref[...]          # (TM, 1) int32 : id codes of the rows in this row tile
    cid = cid_ref[...]          # (1, TK) int32 : id codes of the cols in this col tile

    def col_index():
        return lax.broadcasted_iota(jnp.int32, (tile_m, tile_k), 1) + col0

    def cross_update(sim, j_exp, j_mat, j_rmax, j_mmax, with_nmatch):
        # Masks recomputed per call (single-cycle VPU compares hidden under MXU time) so
        # no (TM, TK) mask temporaries stay live across the four matmul passes.
        cj = col_index()
        valid = cj < b_real
        match = jnp.logical_and(rid == cid, valid)
        matchf = match.astype(jnp.float32)
        # Max-free exp: |sim| <= 1/temperature for unit-norm inputs; invalid columns are
        # removed with a 0/1 multiply instead of a -1e30 masked copy.
        acc_ref[j_exp] += jnp.sum(jnp.exp(sim) * valid.astype(jnp.float32),
                                  axis=1, keepdims=True)
        acc_ref[j_mat] += jnp.sum(sim * matchf, axis=1, keepdims=True)
        acc_ref[j_rmax] = jnp.maximum(
            acc_ref[j_rmax],
            jnp.max(jnp.where(valid, sim, _NEG), axis=1, keepdims=True))
        acc_ref[j_mmax] = jnp.maximum(
            acc_ref[j_mmax],
            jnp.max(jnp.where(match, sim, _NEG), axis=1, keepdims=True))
        if with_nmatch:
            acc_ref[_NMATCH] += jnp.sum(matchf, axis=1, keepdims=True)

    def inst_update(sim, j_exp, j_mat, with_noff):
        cj = col_index()
        ri = lax.broadcasted_iota(jnp.int32, (tile_m, tile_k), 0) + row0
        keep = jnp.logical_and(cj < b_real, cj != ri)          # valid & off-diagonal
        offm = jnp.logical_and(rid == cid, keep)
        offf = offm.astype(jnp.float32)
        acc_ref[j_exp] += jnp.sum(jnp.exp(sim) * keep.astype(jnp.float32),
                                  axis=1, keepdims=True)
        acc_ref[j_mat] += jnp.sum(sim * offf, axis=1, keepdims=True)
        if with_noff:
            acc_ref[_NOFF] += jnp.sum(offf, axis=1, keepdims=True)

    vrow = vrow_ref[...]        # (TM, Dp), normalized and pre-scaled by 1/temperature
    trow = trow_ref[...]
    vcolT = vcolT_ref[...]      # (Dp, TK), normalized (unscaled), pre-transposed
    tcolT = tcolT_ref[...]

    # Four NN-form MXU matmuls with f32 accumulation; each (TM, TK) similarity tile is
    # produced, reduced into the per-row accumulators, then dead before the next one.
    cross_update(jnp.dot(vrow, tcolT, preferred_element_type=jnp.float32),
                 _EXP_V2T, _MAT_V2T, _RMAX_V2T, _MMAX_V2T, with_nmatch=True)
    cross_update(jnp.dot(trow, vcolT, preferred_element_type=jnp.float32),
                 _EXP_T2V, _MAT_T2V, _RMAX_T2V, _MMAX_T2V, with_nmatch=False)
    inst_update(jnp.dot(vrow, vcolT, preferred_element_type=jnp.float32),
                _EXP_VI, _MAT_VI, with_noff=True)
    inst_update(jnp.dot(trow, tcolT, preferred_element_type=jnp.float32),
                _EXP_TI, _MAT_TI, with_noff=False)

    @pl.when(k == pl.num_programs(1) - 1)
    def _finalize():
        nm = acc_ref[_NMATCH]
        noff = acc_ref[_NOFF]

        def cross_loss(j_exp, j_mat):
            per_row = nm * jnp.log(acc_ref[j_exp]) - acc_ref[j_mat]
            return jnp.sum(jnp.where(nm > 0, per_row, 0.0))

        def cross_hits(j_rmax, j_mmax):
            hit = jnp.logical_and(nm > 0, acc_ref[j_mmax] >= acc_ref[j_rmax])
            return jnp.sum(hit.astype(jnp.float32))

        def inst_loss(j_exp, j_mat):
            per_row = noff * jnp.log(acc_ref[j_exp]) - acc_ref[j_mat]
            return jnp.sum(jnp.where(noff > 0, per_row, 0.0))

        vals = (cross_loss(_EXP_V2T, _MAT_V2T),
                cross_loss(_EXP_T2V, _MAT_T2V),
                inst_loss(_EXP_VI, _MAT_VI),
                inst_loss(_EXP_TI, _MAT_TI),
                jnp.sum(noff),
                cross_hits(_RMAX_V2T, _MMAX_V2T),
                cross_hits(_RMAX_T2V, _MMAX_T2V))

        # One unmasked lane-dense (8, 128) store; rows 0..6 broadcast the 7 partial scalars.
        rows8 = lax.broadcasted_iota(jnp.int32, (8, 128), 0)
        slab = jnp.zeros((8, 128), jnp.float32)
        for r, val in enumerate(vals):
            slab = jnp.where(rows8 == r, val, slab)
        o_ref[...] = slab


def _round_up(x, m):
    return ((x + m - 1) // m) * m


def _vmem_limit_bytes(tm, tk, dp, feat_bytes):
    feat = 2 * 2 * (tm + tk) * dp * feat_bytes    # double-buffered row + col tiles (v & t)
    ids = 2 * (tm * 128 + 8 * tk) * 4             # id tiles (lane/sublane padded)
    sim = 4 * tm * tk * 4                         # a few live (TM, TK) f32 temporaries
    acc = _N_ACC * tm * 128 * 4                   # accumulator scratch (lane-padded)
    out = 2 * 8 * 128 * 4
    est = feat + ids + sim + acc + out + (8 << 20)
    try:
        cap = int(getattr(pltpu.get_tpu_info(), "vmem_capacity_bytes", 64 << 20))
    except Exception:
        cap = 64 << 20                            # v7x-safe fallback
    return int(min(max(est, 16 << 20), cap - (4 << 20)))


def decoupled_contrastive_loss(vision_features, text_features, match_ids,
                               temperature=0.07, lambda_v=0.5, lambda_t=0.5,
                               tile_m=128, tile_k=512, use_bf16_matmul=True):
    v = jnp.asarray(vision_features, jnp.float32)
    t = jnp.asarray(text_features, jnp.float32)
    B, D = v.shape
    assert t.shape == (B, D)
    inv_temp = 1.0 / float(temperature)
    # The max-free logsumexp path needs exp(1/temperature) finite in f32.
    assert inv_temp < 80.0, "temperature too small for the max-free logsumexp path"

    # O(B) host work: map (hashable) match ids to dense int codes -- no B^2 matrix.
    code_of = {}
    codes = np.empty((B,), np.int32)
    for i, mid in enumerate(match_ids):
        codes[i] = code_of.setdefault(mid, len(code_of))

    # Tile geometry: rows tiled by TM (multiple of 8), columns by TK (multiple of 128 or
    # the whole padded batch).  Prefer >= 2 row tiles so the "parallel" axis can split
    # across TensorCores.  Bp is a common multiple of TM and TK.
    TM = max(8, min((int(tile_m) // 8) * 8, _round_up(B, 8)))
    if _round_up(B, TM) == TM and TM > 8:
        TM = max(8, _round_up((TM + 1) // 2, 8))
    TK_req = max(128, (int(tile_k) // 128) * 128)
    if B <= TK_req:
        Bp = _round_up(B, TM)
        TK = Bp
    else:
        TK = TK_req
        Bp = _round_up(B, TM * TK // math.gcd(TM, TK))
    num_i = Bp // TM
    num_k = Bp // TK
    Dp = _round_up(D, 128)                         # lane-dense contraction dim

    pad_r, pad_c = Bp - B, Dp - D
    if pad_r or pad_c:
        v = jnp.pad(v, ((0, pad_r), (0, pad_c)))
        t = jnp.pad(t, ((0, pad_r), (0, pad_c)))
    if pad_r:
        # Unique negative sentinels so padded rows never match any real (non-negative) code.
        codes = np.concatenate([codes, -np.arange(1, pad_r + 1, dtype=np.int32)])
    row_ids = jnp.asarray(codes.reshape(Bp, 1))
    col_ids = jnp.asarray(codes.reshape(1, Bp))

    # Normalize once (F.normalize semantics, eps=1e-12 on the norm).  Fold 1/temperature
    # into the row-side copies (O(B*D) once vs O(B^2) per-tile), cast to bf16 for the MXU
    # (f32 accumulation in-kernel), and pre-transpose the column-side copies so every
    # in-kernel matmul is NN form with no per-tile transpose.
    def l2norm(x):
        s = jnp.sum(x * x, axis=1, keepdims=True)
        return x * lax.rsqrt(jnp.maximum(s, 1e-24))

    vn = l2norm(v)
    tn = l2norm(t)
    feat_dt = jnp.bfloat16 if use_bf16_matmul else jnp.float32
    v_rows = (vn * inv_temp).astype(feat_dt)       # (Bp, Dp)
    t_rows = (tn * inv_temp).astype(feat_dt)       # (Bp, Dp)
    v_colsT = vn.T.astype(feat_dt)                 # (Dp, Bp)
    t_colsT = tn.T.astype(feat_dt)                 # (Dp, Bp)

    kernel = functools.partial(_dcl_kernel, tile_m=TM, tile_k=TK, b_real=B)

    partials = pl.pallas_call(
        kernel,
        out_shape=jax.ShapeDtypeStruct((num_i, 8, 128), jnp.float32),
        grid_spec=pltpu.PrefetchScalarGridSpec(
            num_scalar_prefetch=0,
            grid=(num_i, num_k),
            in_specs=[
                pl.BlockSpec((TM, 1), lambda i, k: (i, 0)),     # row id codes
                pl.BlockSpec((1, TK), lambda i, k: (0, k)),     # col id codes
                pl.BlockSpec((TM, Dp), lambda i, k: (i, 0)),    # vision rows (scaled)
                pl.BlockSpec((TM, Dp), lambda i, k: (i, 0)),    # text rows (scaled)
                pl.BlockSpec((Dp, TK), lambda i, k: (0, k)),    # vision cols, transposed
                pl.BlockSpec((Dp, TK), lambda i, k: (0, k)),    # text cols, transposed
            ],
            out_specs=pl.BlockSpec((None, 8, 128), lambda i, k: (i, 0, 0)),
            scratch_shapes=[pltpu.VMEM((_N_ACC, TM, 1), jnp.float32)],
        ),
        compiler_params=pltpu.CompilerParams(
            dimension_semantics=("parallel", "arbitrary"),
            vmem_limit_bytes=_vmem_limit_bytes(
                TM, TK, Dp, 2 if use_bf16_matmul else 4)),
    )(row_ids, col_ids, v_rows, t_rows, v_colsT, t_colsT)

    sums = jnp.sum(partials[:, :, 0], axis=0)                   # (8,) partial-sum reduce
    v2t_sum, t2v_sum, vinst_sum, tinst_sum = sums[0], sums[1], sums[2], sums[3]
    npos, v2t_c, t2v_c = sums[4], sums[5], sums[6]

    has_pos = npos > 0.0
    denom = jnp.maximum(npos, 1.0)
    v2t_loss = jnp.where(has_pos, v2t_sum / denom, 0.0)
    t2v_loss = jnp.where(has_pos, t2v_sum / denom, 0.0)
    vision_inst_loss = jnp.where(has_pos, vinst_sum / denom, 0.0)
    text_inst_loss = jnp.where(has_pos, tinst_sum / denom, 0.0)

    cross_modal_loss = (v2t_loss + t2v_loss) / 2.0
    instance_loss = lambda_v * vision_inst_loss + lambda_t * text_inst_loss
    total_loss = cross_modal_loss + instance_loss

    v2t_accuracy = v2t_c / B
    t2v_accuracy = t2v_c / B

    return {
        "loss": total_loss,
        "cross_modal_loss": cross_modal_loss,
        "instance_loss": instance_loss,
        "v2t_loss": v2t_loss,
        "t2v_loss": t2v_loss,
        "vision_inst_loss": vision_inst_loss,
        "text_inst_loss": text_inst_loss,
        "v2t_accuracy": v2t_accuracy,
        "t2v_accuracy": t2v_accuracy,
        "accuracy": (v2t_accuracy + t2v_accuracy) / 2.0,
    }


def _numpy_reference(v, t, match_ids, temperature=0.07, lambda_v=0.5, lambda_t=0.5):
    v = np.asarray(v, np.float64)
    t = np.asarray(t, np.float64)
    B = v.shape[0]
    v = v / np.maximum(np.linalg.norm(v, axis=1, keepdims=True), 1e-12)
    t = t / np.maximum(np.linalg.norm(t, axis=1, keepdims=True), 1e-12)
    mm = np.array([[match_ids[i] == match_ids[j] for j in range(B)] for i in range(B)])
    eye = np.eye(B, dtype=bool)
    sim = v @ t.T / temperature

    def lse(x, axis):
        mx = np.max(x, axis=axis, keepdims=True)
        return mx + np.log(np.sum(np.exp(x - mx), axis=axis, keepdims=True))

    v2t = np.sum(np.where(mm, lse(sim, 1) - sim, 0.0))
    t2v = np.sum(np.where(mm, lse(sim, 0) - sim, 0.0))
    vs = np.where(eye, -np.inf, v @ v.T / temperature)
    ts = np.where(eye, -np.inf, t @ t.T / temperature)
    offm = mm & ~eye
    vinst = np.sum(np.where(offm, lse(vs, 1) - vs, 0.0))
    tinst = np.sum(np.where(offm, lse(ts, 1) - ts, 0.0))
    npos = offm.sum()
    if npos > 0:
        v2t, t2v, vinst, tinst = (x / npos for x in (v2t, t2v, vinst, tinst))
    else:
        v2t = t2v = vinst = tinst = 0.0
    v2t_acc = np.mean([mm[i, np.argmax(sim[i])] for i in range(B)])
    t2v_acc = np.mean([mm[np.argmax(sim[:, i]), i] for i in range(B)])
    total = (v2t + t2v) / 2 + lambda_v * vinst + lambda_t * tinst
    return total, v2t_acc, t2v_acc


if __name__ == "__main__":
    key = jax.random.PRNGKey(0)
    kv, kt, kv2, kt2, kv3, kt3 = jax.random.split(key, 6)

    # Case 1: single tile, f32 MXU path, tight check.
    B, D = 8, 32
    vision = jax.random.normal(kv, (B, D), dtype=jnp.float32)
    text = jax.random.normal(kt, (B, D), dtype=jnp.float32)
    match_ids = ["a", "a", "b", "c", "c", "c", "d", "e"]
    out = decoupled_contrastive_loss(vision, text, match_ids, use_bf16_matmul=False)
    jax.block_until_ready(out["loss"])
    ref_loss, ref_v2t, ref_t2v = _numpy_reference(np.asarray(vision), np.asarray(text), match_ids)
    np.testing.assert_allclose(float(out["loss"]), ref_loss, rtol=1e-3, atol=1e-2)
    np.testing.assert_allclose(float(out["v2t_accuracy"]), ref_v2t, atol=1e-6)
    np.testing.assert_allclose(float(out["t2v_accuracy"]), ref_t2v, atol=1e-6)

    # Case 2: multiple row tiles + padded rows / feature dim, f32 path.
    B2, D2 = 12, 32
    vision2 = jax.random.normal(kv2, (B2, D2), dtype=jnp.float32)
    text2 = jax.random.normal(kt2, (B2, D2), dtype=jnp.float32)
    match_ids2 = ["a", "a", "b", "b", "b", "c", "d", "d", "e", "f", "f", "f"]
    out2 = decoupled_contrastive_loss(vision2, text2, match_ids2, tile_m=8,
                                      use_bf16_matmul=False)
    jax.block_until_ready(out2["loss"])
    ref2 = _numpy_reference(np.asarray(vision2), np.asarray(text2), match_ids2)
    np.testing.assert_allclose(float(out2["loss"]), ref2[0], rtol=1e-3, atol=1e-2)
    np.testing.assert_allclose(float(out2["v2t_accuracy"]), ref2[1], atol=1e-6)
    np.testing.assert_allclose(float(out2["t2v_accuracy"]), ref2[2], atol=1e-6)

    # Case 3: 2x2 grid (row AND column tiles) exercising the online column accumulation.
    B3, D3 = 160, 48
    vision3 = jax.random.normal(kv3, (B3, D3), dtype=jnp.float32)
    text3 = jax.random.normal(kt3, (B3, D3), dtype=jnp.float32)
    match_ids3 = [f"g{i % 80}" for i in range(B3)]      # each id appears twice
    ref3 = _numpy_reference(np.asarray(vision3), np.asarray(text3), match_ids3)
    # 3a: f32 path, tight check.
    out3 = decoupled_contrastive_loss(vision3, text3, match_ids3, tile_m=128, tile_k=128,
                                      use_bf16_matmul=False)
    jax.block_until_ready(out3["loss"])
    np.testing.assert_allclose(float(out3["loss"]), ref3[0], rtol=1e-3, atol=1e-2)
    np.testing.assert_allclose(float(out3["v2t_accuracy"]), ref3[1], atol=1e-6)
    np.testing.assert_allclose(float(out3["t2v_accuracy"]), ref3[2], atol=1e-6)
    # 3b: default bf16 MXU path (looser tolerance; near-ties may flip a row or two).
    out3b = decoupled_contrastive_loss(vision3, text3, match_ids3, tile_m=128, tile_k=128)
    jax.block_until_ready(out3b["loss"])
    np.testing.assert_allclose(float(out3b["loss"]), ref3[0], rtol=5e-2, atol=0.3)
    np.testing.assert_allclose(float(out3b["v2t_accuracy"]), ref3[1], atol=0.05)
    np.testing.assert_allclose(float(out3b["t2v_accuracy"]), ref3[2], atol=0.05)

    print("KERNEL_OK")
</pallas_src>

<mosaic_0001>
module attributes {stable_mosaic.version = 11 : i64} {
  func.func @_dcl_kernel(%arg0: i32, %arg1: i32, %arg2: memref<8x1xi32, #tpu.memory_space<vmem>>, %arg3: memref<1x8xi32, #tpu.memory_space<vmem>>, %arg4: memref<8x128xf32, #tpu.memory_space<vmem>>, %arg5: memref<8x128xf32, #tpu.memory_space<vmem>>, %arg6: memref<128x8xf32, #tpu.memory_space<vmem>>, %arg7: memref<128x8xf32, #tpu.memory_space<vmem>>, %arg8: memref<1x8x128xf32, #tpu.memory_space<vmem>>, %arg9: memref<14x8x1xf32, #tpu.memory_space<vmem>>) attributes {dimension_semantics = [#tpu.dimension_semantics<parallel>, #tpu.dimension_semantics<arbitrary>], iteration_bounds = array<i64: 1, 1>, scalar_prefetch = 0 : i64, scratch_operands = 1 : i64, tpu.core_type = #tpu.core_type<tc>, window_params = [{transform_indices = @transform_0, window_bounds = array<i64: 8, 1>}, {transform_indices = @transform_1, window_bounds = array<i64: 1, 8>}, {transform_indices = @transform_2, window_bounds = array<i64: 8, 128>}, {transform_indices = @transform_3, window_bounds = array<i64: 8, 128>}, {transform_indices = @transform_4, window_bounds = array<i64: 128, 8>}, {transform_indices = @transform_5, window_bounds = array<i64: 128, 8>}, {transform_indices = @transform_6, window_bounds = array<i64: 1, 8, 128>}]} {
    %c8_i32 = arith.constant 8 : i32
    %0 = arith.muli %arg0, %c8_i32 : i32
    %c8_i32_0 = arith.constant 8 : i32
    %1 = arith.muli %arg1, %c8_i32_0 : i32
    %c0_i32 = arith.constant 0 : i32
    %2 = arith.cmpi eq, %arg1, %c0_i32 : i32
    %3 = arith.extui %2 : i1 to i32
    %c0_i32_1 = arith.constant 0 : i32
    %4 = arith.cmpi ne, %3, %c0_i32_1 : i32
    scf.if %4 {
      %cst_111 = arith.constant 0.000000e+00 : f32
      %212 = vector.broadcast %cst_111 : f32 to vector<14x8x1xf32>
      %c0_112 = arith.constant 0 : index
      %c0_113 = arith.constant 0 : index
      %c0_114 = arith.constant 0 : index
      %213 = vector.load %arg9[%c0_112, %c0_113, %c0_114] : memref<14x8x1xf32, #tpu.memory_space<vmem>>, vector<14x8x1xf32>
      tpu.vector_store %arg9[%c0_112, %c0_113, %c0_114], %212 {strides = array<i32>} : memref<14x8x1xf32, #tpu.memory_space<vmem>>, vector<14x8x1xf32>,
      %cst_115 = arith.constant -1.000000e+30 : f32
      %214 = vector.broadcast %cst_115 : f32 to vector<8x1xf32>
      %c2_116 = arith.constant 2 : index
      %c0_117 = arith.constant 0 : index
      %c0_118 = arith.constant 0 : index
      %215 = vector.load %arg9[%c2_116, %c0_117, %c0_118] : memref<14x8x1xf32, #tpu.memory_space<vmem>>, vector<1x8x1xf32>
      %216 = vector.shape_cast %215 : vector<1x8x1xf32> to vector<8x1xf32>
      %217 = vector.shape_cast %214 : vector<8x1xf32> to vector<1x8x1xf32>
      tpu.vector_store %arg9[%c2_116, %c0_117, %c0_118], %217 {strides = array<i32>} : memref<14x8x1xf32, #tpu.memory_space<vmem>>, vector<1x8x1xf32>,
      %c3_119 = arith.constant 3 : index
      %c0_120 = arith.constant 0 : index
      %c0_121 = arith.constant 0 : index
      %218 = vector.load %arg9[%c3_119, %c0_120, %c0_121] : memref<14x8x1xf32, #tpu.memory_space<vmem>>, vector<1x8x1xf32>
      %219 = vector.shape_cast %218 : vector<1x8x1xf32> to vector<8x1xf32>
      %220 = vector.shape_cast %214 : vector<8x1xf32> to vector<1x8x1xf32>
      tpu.vector_store %arg9[%c3_119, %c0_120, %c0_121], %220 {strides = array<i32>} : memref<14x8x1xf32, #tpu.memory_space<vmem>>, vector<1x8x1xf32>,
      %c6_122 = arith.constant 6 : index
      %c0_123 = arith.constant 0 : index
      %c0_124 = arith.constant 0 : index
      %221 = vector.load %arg9[%c6_122, %c0_123, %c0_124] : memref<14x8x1xf32, #tpu.memory_space<vmem>>, vector<1x8x1xf32>
      %222 = vector.shape_cast %221 : vector<1x8x1xf32> to vector<8x1xf32>
      %223 = vector.shape_cast %214 : vector<8x1xf32> to vector<1x8x1xf32>
      tpu.vector_store %arg9[%c6_122, %c0_123, %c0_124], %223 {strides = array<i32>} : memref<14x8x1xf32, #tpu.memory_space<vmem>>, vector<1x8x1xf32>,
      %c7_125 = arith.constant 7 : index
      %c0_126 = arith.constant 0 : index
      %c0_127 = arith.constant 0 : index
      %224 = vector.load %arg9[%c7_125, %c0_126, %c0_127] : memref<14x8x1xf32, #tpu.memory_space<vmem>>, vector<1x8x1xf32>
      %225 = vector.shape_cast %224 : vector<1x8x1xf32> to vector<8x1xf32>
      %226 = vector.shape_cast %214 : vector<8x1xf32> to vector<1x8x1xf32>
      tpu.vector_store %arg9[%c7_125, %c0_126, %c0_127], %226 {strides = array<i32>} : memref<14x8x1xf32, #tpu.memory_space<vmem>>, vector<1x8x1xf32>,
    } else {
    }
    %c0 = arith.constant 0 : index
    %c0_2 = arith.constant 0 : index
    %5 = vector.load %arg2[%c0, %c0_2] : memref<8x1xi32, #tpu.memory_space<vmem>>, vector<8x1xi32>
    %c0_3 = arith.constant 0 : index
    %c0_4 = arith.constant 0 : index
    %6 = vector.load %arg3[%c0_3, %c0_4] : memref<1x8xi32, #tpu.memory_space<vmem>>, vector<1x8xi32>
    %c0_5 = arith.constant 0 : index
    %c0_6 = arith.constant 0 : index
    %7 = vector.load %arg4[%c0_5, %c0_6] : memref<8x128xf32, #tpu.memory_space<vmem>>, vector<8x128xf32>
    %c0_7 = arith.constant 0 : index
    %c0_8 = arith.constant 0 : index
    %8 = vector.load %arg5[%c0_7, %c0_8] : memref<8x128xf32, #tpu.memory_space<vmem>>, vector<8x128xf32>
    %c0_9 = arith.constant 0 : index
    %c0_10 = arith.constant 0 : index
    %9 = vector.load %arg6[%c0_9, %c0_10] : memref<128x8xf32, #tpu.memory_space<vmem>>, vector<128x8xf32>
    %c0_11 = arith.constant 0 : index
    %c0_12 = arith.constant 0 : index
    %10 = vector.load %arg7[%c0_11, %c0_12] : memref<128x8xf32, #tpu.memory_space<vmem>>, vector<128x8xf32>
    %cst = arith.constant dense<0.000000e+00> : vector<8x8xf32>
    %11 = tpu.matmul %7, %10, %cst {dimension_numbers = #tpu.dot_dimension_numbers<[1], [0], [0], [1], [0, 0, 1, 1], [], []>} : vector<8x128xf32>, vector<128x8xf32>, vector<8x8xf32> -> vector<8x8xf32>
    %12 = tpu.iota {dimensions = array<i32: 1>} : vector<8x8xi32>
    %13 = vector.broadcast %1 : i32 to vector<8x8xi32>
    %14 = arith.addi %12, %13 : vector<8x8xi32>
    %c8_i32_13 = arith.constant 8 : i32
    %15 = vector.broadcast %c8_i32_13 : i32 to vector<8x8xi32>
    %16 = arith.cmpi slt, %14, %15 : vector<8x8xi32>
    %17 = vector.broadcast %5 : vector<8x1xi32> to vector<8x8xi32>
    %18 = vector.broadcast %6 : vector<1x8xi32> to vector<8x8xi32>
    %19 = arith.cmpi eq, %17, %18 : vector<8x8xi32>
    %20 = arith.andi %19, %16 : vector<8x8xi1>
    %21 = arith.extui %20 : vector<8x8xi1> to vector<8x8xi32>
    %22 = arith.sitofp %21 : vector<8x8xi32> to vector<8x8xf32>
    %c0_14 = arith.constant 0 : index
    %c0_15 = arith.constant 0 : index
    %c0_16 = arith.constant 0 : index
    %23 = vector.load %arg9[%c0_14, %c0_15, %c0_16] : memref<14x8x1xf32, #tpu.memory_space<vmem>>, vector<1x8x1xf32>
    %24 = vector.shape_cast %23 : vector<1x8x1xf32> to vector<8x1xf32>
    %25 = math.exp %11 : vector<8x8xf32>
    %26 = arith.extui %16 : vector<8x8xi1> to vector<8x8xi32>
    %27 = arith.sitofp %26 : vector<8x8xi32> to vector<8x8xf32>
    %28 = arith.mulf %25, %27 : vector<8x8xf32>
    %cst_17 = arith.constant dense<0.000000e+00> : vector<8xf32>
    %29 = vector.multi_reduction <add>, %28, %cst_17 [1] : vector<8x8xf32> to vector<8xf32>
    %30 = vector.shape_cast %29 : vector<8xf32> to vector<8x1xf32>
    %31 = arith.addf %24, %30 : vector<8x1xf32>
    %c0_18 = arith.constant 0 : index
    %c0_19 = arith.constant 0 : index
    %c0_20 = arith.constant 0 : index
    %32 = vector.load %arg9[%c0_18, %c0_19, %c0_20] : memref<14x8x1xf32, #tpu.memory_space<vmem>>, vector<1x8x1xf32>
    %33 = vector.shape_cast %32 : vector<1x8x1xf32> to vector<8x1xf32>
    %34 = vector.shape_cast %31 : vector<8x1xf32> to vector<1x8x1xf32>
    tpu.vector_store %arg9[%c0_18, %c0_19, %c0_20], %34 {strides = array<i32>} : memref<14x8x1xf32, #tpu.memory_space<vmem>>, vector<1x8x1xf32>,
    %c1 = arith.constant 1 : index
    %c0_21 = arith.constant 0 : index
    %c0_22 = arith.constant 0 : index
    %35 = vector.load %arg9[%c1, %c0_21, %c0_22] : memref<14x8x1xf32, #tpu.memory_space<vmem>>, vector<1x8x1xf32>
    %36 = vector.shape_cast %35 : vector<1x8x1xf32> to vector<8x1xf32>
    %37 = arith.mulf %11, %22 : vector<8x8xf32>
    %cst_23 = arith.constant dense<0.000000e+00> : vector<8xf32>
    %38 = vector.multi_reduction <add>, %37, %cst_23 [1] : vector<8x8xf32> to vector<8xf32>
    %39 = vector.shape_cast %38 : vector<8xf32> to vector<8x1xf32>
    %40 = arith.addf %36, %39 : vector<8x1xf32>
    %c1_24 = arith.constant 1 : index
    %c0_25 = arith.constant 0 : index
    %c0_26 = arith.constant 0 : index
    %41 = vector.load %arg9[%c1_24, %c0_25, %c0_26] : memref<14x8x1xf32, #tpu.memory_space<vmem>>, vector<1x8x1xf32>
    %42 = vector.shape_cast %41 : vector<1x8x1xf32> to vector<8x1xf32>
    %43 = vector.shape_cast %40 : vector<8x1xf32> to vector<1x8x1xf32>
    tpu.vector_store %arg9[%c1_24, %c0_25, %c0_26], %43 {strides = array<i32>} : memref<14x8x1xf32, #tpu.memory_space<vmem>>, vector<1x8x1xf32>,
    %c2 = arith.constant 2 : index
    %c0_27 = arith.constant 0 : index
    %c0_28 = arith.constant 0 : index
    %44 = vector.load %arg9[%c2, %c0_27, %c0_28] : memref<14x8x1xf32, #tpu.memory_space<vmem>>, vector<1x8x1xf32>
    %45 = vector.shape_cast %44 : vector<1x8x1xf32> to vector<8x1xf32>
    %cst_29 = arith.constant -1.000000e+30 : f32
    %46 = vector.broadcast %cst_29 : f32 to vector<8x8xf32>
    %47 = arith.select %16, %11, %46 : vector<8x8xi1>, vector<8x8xf32>
    %cst_30 = arith.constant dense<0xFF800000> : vector<8xf32>
    %48 = vector.multi_reduction <maximumf>, %47, %cst_30 [1] : vector<8x8xf32> to vector<8xf32>
    %49 = vector.shape_cast %48 : vector<8xf32> to vector<8x1xf32>
    %50 = arith.maximumf %45, %49 : vector<8x1xf32>
    %c2_31 = arith.constant 2 : index
    %c0_32 = arith.constant 0 : index
    %c0_33 = arith.constant 0 : index
    %51 = vector.load %arg9[%c2_31, %c0_32, %c0_33] : memref<14x8x1xf32, #tpu.memory_space<vmem>>, vector<1x8x1xf32>
    %52 = vector.shape_cast %51 : vector<1x8x1xf32> to vector<8x1xf32>
    %53 = vector.shape_cast %50 : vector<8x1xf32> to vector<1x8x1xf32>
    tpu.vector_store %arg9[%c2_31, %c0_32, %c0_33], %53 {strides = array<i32>} : memref<14x8x1xf32, #tpu.memory_space<vmem>>, vector<1x8x1xf32>,
    %c3 = arith.constant 3 : index
    %c0_34 = arith.constant 0 : index
    %c0_35 = arith.constant 0 : index
    %54 = vector.load %arg9[%c3, %c0_34, %c0_35] : memref<14x8x1xf32, #tpu.memory_space<vmem>>, vector<1x8x1xf32>
    %55 = vector.shape_cast %54 : vector<1x8x1xf32> to vector<8x1xf32>
    %cst_36 = arith.constant -1.000000e+30 : f32
    %56 = vector.broadcast %cst_36 : f32 to vector<8x8xf32>
    %57 = arith.select %20, %11, %56 : vector<8x8xi1>, vector<8x8xf32>
    %cst_37 = arith.constant dense<0xFF800000> : vector<8xf32>
    %58 = vector.multi_reduction <maximumf>, %57, %cst_37 [1] : vector<8x8xf32> to vector<8xf32>
    %59 = vector.shape_cast %58 : vector<8xf32> to vector<8x1xf32>
    %60 = arith.maximumf %55, %59 : vector<8x1xf32>
    %c3_38 = arith.constant 3 : index
    %c0_39 = arith.constant 0 : index
    %c0_40 = arith.constant 0 : index
    %61 = vector.load %arg9[%c3_38, %c0_39, %c0_40] : memref<14x8x1xf32, #tpu.memory_space<vmem>>, vector<1x8x1xf32>
    %62 = vector.shape_cast %61 : vector<1x8x1xf32> to vector<8x1xf32>
    %63 = vector.shape_cast %60 : vector<8x1xf32> to vector<1x8x1xf32>
    tpu.vector_store %arg9[%c3_38, %c0_39, %c0_40], %63 {strides = array<i32>} : memref<14x8x1xf32, #tpu.memory_space<vmem>>, vector<1x8x1xf32>,
    %c12 = arith.constant 12 : index
    %c0_41 = arith.constant 0 : index
    %c0_42 = arith.constant 0 : index
    %64 = vector.load %arg9[%c12, %c0_41, %c0_42] : memref<14x8x1xf32, #tpu.memory_space<vmem>>, vector<1x8x1xf32>
    %65 = vector.shape_cast %64 : vector<1x8x1xf32> to vector<8x1xf32>
    %cst_43 = arith.constant dense<0.000000e+00> : vector<8xf32>
    %66 = vector.multi_reduction <add>, %22, %cst_43 [1] : vector<8x8xf32> to vector<8xf32>
    %67 = vector.shape_cast %66 : vector<8xf32> to vector<8x1xf32>
    %68 = arith.addf %65, %67 : vector<8x1xf32>
    %c12_44 = arith.constant 12 : index
    %c0_45 = arith.constant 0 : index
    %c0_46 = arith.constant 0 : index
    %69 = vector.load %arg9[%c12_44, %c0_45, %c0_46] : memref<14x8x1xf32, #tpu.memory_space<vmem>>, vector<1x8x1xf32>
    %70 = vector.shape_cast %69 : vector<1x8x1xf32> to vector<8x1xf32>
    %71 = vector.shape_cast %68 : vector<8x1xf32> to vector<1x8x1xf32>
    tpu.vector_store %arg9[%c12_44, %c0_45, %c0_46], %71 {strides = array<i32>} : memref<14x8x1xf32, #tpu.memory_space<vmem>>, vector<1x8x1xf32>,
    %cst_47 = arith.constant dense<0.000000e+00> : vector<8x8xf32>
    %72 = tpu.matmul %8, %9, %cst_47 {dimension_numbers = #tpu.dot_dimension_numbers<[1], [0], [0], [1], [0, 0, 1, 1], [], []>} : vector<8x128xf32>, vector<128x8xf32>, vector<8x8xf32> -> vector<8x8xf32>
    %73 = tpu.iota {dimensions = array<i32: 1>} : vector<8x8xi32>
    %74 = vector.broadcast %1 : i32 to vector<8x8xi32>
    %75 = arith.addi %73, %74 : vector<8x8xi32>
    %c8_i32_48 = arith.constant 8 : i32
    %76 = vector.broadcast %c8_i32_48 : i32 to vector<8x8xi32>
    %77 = arith.cmpi slt, %75, %76 : vector<8x8xi32>
    %78 = vector.broadcast %5 : vector<8x1xi32> to vector<8x8xi32>
    %79 = vector.broadcast %6 : vector<1x8xi32> to vector<8x8xi32>
    %80 = arith.cmpi eq, %78, %79 : vector<8x8xi32>
    %81 = arith.andi %80, %77 : vector<8x8xi1>
    %82 = arith.extui %81 : vector<8x8xi1> to vector<8x8xi32>
    %83 = arith.sitofp %82 : vector<8x8xi32> to vector<8x8xf32>
    %c4 = arith.constant 4 : index
    %c0_49 = arith.constant 0 : index
    %c0_50 = arith.constant 0 : index
    %84 = vector.load %arg9[%c4, %c0_49, %c0_50] : memref<14x8x1xf32, #tpu.memory_space<vmem>>, vector<1x8x1xf32>
    %85 = vector.shape_cast %84 : vector<1x8x1xf32> to vector<8x1xf32>
    %86 = math.exp %72 : vector<8x8xf32>
    %87 = arith.extui %77 : vector<8x8xi1> to vector<8x8xi32>
    %88 = arith.sitofp %87 : vector<8x8xi32> to vector<8x8xf32>
    %89 = arith.mulf %86, %88 : vector<8x8xf32>
    %cst_51 = arith.constant dense<0.000000e+00> : vector<8xf32>
    %90 = vector.multi_reduction <add>, %89, %cst_51 [1] : vector<8x8xf32> to vector<8xf32>
    %91 = vector.shape_cast %90 : vector<8xf32> to vector<8x1xf32>
    %92 = arith.addf %85, %91 : vector<8x1xf32>
    %c4_52 = arith.constant 4 : index
    %c0_53 = arith.constant 0 : index
    %c0_54 = arith.constant 0 : index
    %93 = vector.load %arg9[%c4_52, %c0_53, %c0_54] : memref<14x8x1xf32, #tpu.memory_space<vmem>>, vector<1x8x1xf32>
    %94 = vector.shape_cast %93 : vector<1x8x1xf32> to vector<8x1xf32>
    %95 = vector.shape_cast %92 : vector<8x1xf32> to vector<1x8x1xf32>
    tpu.vector_store %arg9[%c4_52, %c0_53, %c0_54], %95 {strides = array<i32>} : memref<14x8x1xf32, #tpu.memory_space<vmem>>, vector<1x8x1xf32>,
    %c5 = arith.constant 5 : index
    %c0_55 = arith.constant 0 : index
    %c0_56 = arith.constant 0 : index
    %96 = vector.load %arg9[%c5, %c0_55, %c0_56] : memref<14x8x1xf32, #tpu.memory_space<vmem>>, vector<1x8x1xf32>
    %97 = vector.shape_cast %96 : vector<1x8x1xf32> to vector<8x1xf32>
    %98 = arith.mulf %72, %83 : vector<8x8xf32>
    %cst_57 = arith.constant dense<0.000000e+00> : vector<8xf32>
    %99 = vector.multi_reduction <add>, %98, %cst_57 [1] : vector<8x8xf32> to vector<8xf32>
    %100 = vector.shape_cast %99 : vector<8xf32> to vector<8x1xf32>
    %101 = arith.addf %97, %100 : vector<8x1xf32>
    %c5_58 = arith.constant 5 : index
    %c0_59 = arith.constant 0 : index
    %c0_60 = arith.constant 0 : index
    %102 = vector.load %arg9[%c5_58, %c0_59, %c0_60] : memref<14x8x1xf32, #tpu.memory_space<vmem>>, vector<1x8x1xf32>
    %103 = vector.shape_cast %102 : vector<1x8x1xf32> to vector<8x1xf32>
    %104 = vector.shape_cast %101 : vector<8x1xf32> to vector<1x8x1xf32>
    tpu.vector_store %arg9[%c5_58, %c0_59, %c0_60], %104 {strides = array<i32>} : memref<14x8x1xf32, #tpu.memory_space<vmem>>, vector<1x8x1xf32>,
    %c6 = arith.constant 6 : index
    %c0_61 = arith.constant 0 : index
    %c0_62 = arith.constant 0 : index
    %105 = vector.load %arg9[%c6, %c0_61, %c0_62] : memref<14x8x1xf32, #tpu.memory_space<vmem>>, vector<1x8x1xf32>
    %106 = vector.shape_cast %105 : vector<1x8x1xf32> to vector<8x1xf32>
    %cst_63 = arith.constant -1.000000e+30 : f32
    %107 = vector.broadcast %cst_63 : f32 to vector<8x8xf32>
    %108 = arith.select %77, %72, %107 : vector<8x8xi1>, vector<8x8xf32>
    %cst_64 = arith.constant dense<0xFF800000> : vector<8xf32>
    %109 = vector.multi_reduction <maximumf>, %108, %cst_64 [1] : vector<8x8xf32> to vector<8xf32>
    %110 = vector.shape_cast %109 : vector<8xf32> to vector<8x1xf32>
    %111 = arith.maximumf %106, %110 : vector<8x1xf32>
    %c6_65 = arith.constant 6 : index
    %c0_66 = arith.constant 0 : index
    %c0_67 = arith.constant 0 : index
    %112 = vector.load %arg9[%c6_65, %c0_66, %c0_67] : memref<14x8x1xf32, #tpu.memory_space<vmem>>, vector<1x8x1xf32>
    %113 = vector.shape_cast %112 : vector<1x8x1xf32> to vector<8x1xf32>
    %114 = vector.shape_cast %111 : vector<8x1xf32> to vector<1x8x1xf32>
    tpu.vector_store %arg9[%c6_65, %c0_66, %c0_67], %114 {strides = array<i32>} : memref<14x8x1xf32, #tpu.memory_space<vmem>>, vector<1x8x1xf32>,
    %c7 = arith.constant 7 : index
    %c0_68 = arith.constant 0 : index
    %c0_69 = arith.constant 0 : index
    %115 = vector.load %arg9[%c7, %c0_68, %c0_69] : memref<14x8x1xf32, #tpu.memory_space<vmem>>, vector<1x8x1xf32>
    %116 = vector.shape_cast %115 : vector<1x8x1xf32> to vector<8x1xf32>
    %cst_70 = arith.constant -1.000000e+30 : f32
    %117 = vector.broadcast %cst_70 : f32 to vector<8x8xf32>
    %118 = arith.select %81, %72, %117 : vector<8x8xi1>, vector<8x8xf32>
    %cst_71 = arith.constant dense<0xFF800000> : vector<8xf32>
    %119 = vector.multi_reduction <maximumf>, %118, %cst_71 [1] : vector<8x8xf32> to vector<8xf32>
    %120 = vector.shape_cast %119 : vector<8xf32> to vector<8x1xf32>
    %121 = arith.maximumf %116, %120 : vector<8x1xf32>
    %c7_72 = arith.constant 7 : index
    %c0_73 = arith.constant 0 : index
    %c0_74 = arith.constant 0 : index
    %122 = vector.load %arg9[%c7_72, %c0_73, %c0_74] : memref<14x8x1xf32, #tpu.memory_space<vmem>>, vector<1x8x1xf32>
    %123 = vector.shape_cast %122 : vector<1x8x1xf32> to vector<8x1xf32>
    %124 = vector.shape_cast %121 : vector<8x1xf32> to vector<1x8x1xf32>
    tpu.vector_store %arg9[%c7_72, %c0_73, %c0_74], %124 {strides = array<i32>} : memref<14x8x1xf32, #tpu.memory_space<vmem>>, vector<1x8x1xf32>,
    %cst_75 = arith.constant dense<0.000000e+00> : vector<8x8xf32>
    %125 = tpu.matmul %7, %9, %cst_75 {dimension_numbers = #tpu.dot_dimension_numbers<[1], [0], [0], [1], [0, 0, 1, 1], [], []>} : vector<8x128xf32>, vector<128x8xf32>, vector<8x8xf32> -> vector<8x8xf32>
    %126 = tpu.iota {dimensions = array<i32: 1>} : vector<8x8xi32>
    %127 = vector.broadcast %1 : i32 to vector<8x8xi32>
    %128 = arith.addi %126, %127 : vector<8x8xi32>
    %129 = tpu.iota {dimensions = array<i32: 0>} : vector<8x8xi32>
    %130 = vector.broadcast %0 : i32 to vector<8x8xi32>
    %131 = arith.addi %129, %130 : vector<8x8xi32>
    %c8_i32_76 = arith.constant 8 : i32
    %132 = vector.broadcast %c8_i32_76 : i32 to vector<8x8xi32>
    %133 = arith.cmpi slt, %128, %132 : vector<8x8xi32>
    %134 = arith.cmpi ne, %128, %131 : vector<8x8xi32>
    %135 = arith.andi %133, %134 : vector<8x8xi1>
    %136 = vector.broadcast %5 : vector<8x1xi32> to vector<8x8xi32>
    %137 = vector.broadcast %6 : vector<1x8xi32> to vector<8x8xi32>
    %138 = arith.cmpi eq, %136, %137 : vector<8x8xi32>
    %139 = arith.andi %138, %135 : vector<8x8xi1>
    %140 = arith.extui %139 : vector<8x8xi1> to vector<8x8xi32>
    %141 = arith.sitofp %140 : vector<8x8xi32> to vector<8x8xf32>
    %c8 = arith.constant 8 : index
    %c0_77 = arith.constant 0 : index
    %c0_78 = arith.constant 0 : index
    %142 = vector.load %arg9[%c8, %c0_77, %c0_78] : memref<14x8x1xf32, #tpu.memory_space<vmem>>, vector<1x8x1xf32>
    %143 = vector.shape_cast %142 : vector<1x8x1xf32> to vector<8x1xf32>
    %144 = math.exp %125 : vector<8x8xf32>
    %145 = arith.extui %135 : vector<8x8xi1> to vector<8x8xi32>
    %146 = arith.sitofp %145 : vector<8x8xi32> to vector<8x8xf32>
    %147 = arith.mulf %144, %146 : vector<8x8xf32>
    %cst_79 = arith.constant dense<0.000000e+00> : vector<8xf32>
    %148 = vector.multi_reduction <add>, %147, %cst_79 [1] : vector<8x8xf32> to vector<8xf32>
    %149 = vector.shape_cast %148 : vector<8xf32> to vector<8x1xf32>
    %150 = arith.addf %143, %149 : vector<8x1xf32>
    %c8_80 = arith.constant 8 : index
    %c0_81 = arith.constant 0 : index
    %c0_82 = arith.constant 0 : index
    %151 = vector.load %arg9[%c8_80, %c0_81, %c0_82] : memref<14x8x1xf32, #tpu.memory_space<vmem>>, vector<1x8x1xf32>
    %152 = vector.shape_cast %151 : vector<1x8x1xf32> to vector<8x1xf32>
    %153 = vector.shape_cast %150 : vector<8x1xf32> to vector<1x8x1xf32>
    tpu.vector_store %arg9[%c8_80, %c0_81, %c0_82], %153 {strides = array<i32>} : memref<14x8x1xf32, #tpu.memory_space<vmem>>, vector<1x8x1xf32>,
    %c9 = arith.constant 9 : index
    %c0_83 = arith.constant 0 : index
    %c0_84 = arith.constant 0 : index
    %154 = vector.load %arg9[%c9, %c0_83, %c0_84] : memref<14x8x1xf32, #tpu.memory_space<vmem>>, vector<1x8x1xf32>
    %155 = vector.shape_cast %154 : vector<1x8x1xf32> to vector<8x1xf32>
    %156 = arith.mulf %125, %141 : vector<8x8xf32>
    %cst_85 = arith.constant dense<0.000000e+00> : vector<8xf32>
    %157 = vector.multi_reduction <add>, %156, %cst_85 [1] : vector<8x8xf32> to vector<8xf32>
    %158 = vector.shape_cast %157 : vector<8xf32> to vector<8x1xf32>
    %159 = arith.addf %155, %158 : vector<8x1xf32>
    %c9_86 = arith.constant 9 : index
    %c0_87 = arith.constant 0 : index
    %c0_88 = arith.constant 0 : index
    %160 = vector.load %arg9[%c9_86, %c0_87, %c0_88] : memref<14x8x1xf32, #tpu.memory_space<vmem>>, vector<1x8x1xf32>
    %161 = vector.shape_cast %160 : vector<1x8x1xf32> to vector<8x1xf32>
    %162 = vector.shape_cast %159 : vector<8x1xf32> to vector<1x8x1xf32>
    tpu.vector_store %arg9[%c9_86, %c0_87, %c0_88], %162 {strides = array<i32>} : memref<14x8x1xf32, #tpu.memory_space<vmem>>, vector<1x8x1xf32>,
    %c13 = arith.constant 13 : index
    %c0_89 = arith.constant 0 : index
    %c0_90 = arith.constant 0 : index
    %163 = vector.load %arg9[%c13, %c0_89, %c0_90] : memref<14x8x1xf32, #tpu.memory_space<vmem>>, vector<1x8x1xf32>
    %164 = vector.shape_cast %163 : vector<1x8x1xf32> to vector<8x1xf32>
    %cst_91 = arith.constant dense<0.000000e+00> : vector<8xf32>
    %165 = vector.multi_reduction <add>, %141, %cst_91 [1] : vector<8x8xf32> to vector<8xf32>
    %166 = vector.shape_cast %165 : vector<8xf32> to vector<8x1xf32>
    %167 = arith.addf %164, %166 : vector<8x1xf32>
    %c13_92 = arith.constant 13 : index
    %c0_93 = arith.constant 0 : index
    %c0_94 = arith.constant 0 : index
    %168 = vector.load %arg9[%c13_92, %c0_93, %c0_94] : memref<14x8x1xf32, #tpu.memory_space<vmem>>, vector<1x8x1xf32>
    %169 = vector.shape_cast %168 : vector<1x8x1xf32> to vector<8x1xf32>
    %170 = vector.shape_cast %167 : vector<8x1xf32> to vector<1x8x1xf32>
    tpu.vector_store %arg9[%c13_92, %c0_93, %c0_94], %170 {strides = array<i32>} : memref<14x8x1xf32, #tpu.memory_space<vmem>>, vector<1x8x1xf32>,
    %cst_95 = arith.constant dense<0.000000e+00> : vector<8x8xf32>
    %171 = tpu.matmul %8, %10, %cst_95 {dimension_numbers = #tpu.dot_dimension_numbers<[1], [0], [0], [1], [0, 0, 1, 1], [], []>} : vector<8x128xf32>, vector<128x8xf32>, vector<8x8xf32> -> vector<8x8xf32>
    %172 = tpu.iota {dimensions = array<i32: 1>} : vector<8x8xi32>
    %173 = vector.broadcast %1 : i32 to vector<8x8xi32>
    %174 = arith.addi %172, %173 : vector<8x8xi32>
    %175 = tpu.iota {dimensions = array<i32: 0>} : vector<8x8xi32>
    %176 = vector.broadcast %0 : i32 to vector<8x8xi32>
    %177 = arith.addi %175, %176 : vector<8x8xi32>
    %c8_i32_96 = arith.constant 8 : i32
    %178 = vector.broadcast %c8_i32_96 : i32 to vector<8x8xi32>
    %179 = arith.cmpi slt, %174, %178 : vector<8x8xi32>
    %180 = arith.cmpi ne, %174, %177 : vector<8x8xi32>
    %181 = arith.andi %179, %180 : vector<8x8xi1>
    %182 = vector.broadcast %5 : vector<8x1xi32> to vector<8x8xi32>
    %183 = vector.broadcast %6 : vector<1x8xi32> to vector<8x8xi32>
    %184 = arith.cmpi eq, %182, %183 : vector<8x8xi32>
    %185 = arith.andi %184, %181 : vector<8x8xi1>
    %186 = arith.extui %185 : vector<8x8xi1> to vector<8x8xi32>
    %187 = arith.sitofp %186 : vector<8x8xi32> to vector<8x8xf32>
    %c10 = arith.constant 10 : index
    %c0_97 = arith.constant 0 : index
    %c0_98 = arith.constant 0 : index
    %188 = vector.load %arg9[%c10, %c0_97, %c0_98] : memref<14x8x1xf32, #tpu.memory_space<vmem>>, vector<1x8x1xf32>
    %189 = vector.shape_cast %188 : vector<1x8x1xf32> to vector<8x1xf32>
    %190 = math.exp %171 : vector<8x8xf32>
    %191 = arith.extui %181 : vector<8x8xi1> to vector<8x8xi32>
    %192 = arith.sitofp %191 : vector<8x8xi32> to vector<8x8xf32>
    %193 = arith.mulf %190, %192 : vector<8x8xf32>
    %cst_99 = arith.constant dense<0.000000e+00> : vector<8xf32>
    %194 = vector.multi_reduction <add>, %193, %cst_99 [1] : vector<8x8xf32> to vector<8xf32>
    %195 = vector.shape_cast %194 : vector<8xf32> to vector<8x1xf32>
    %196 = arith.addf %189, %195 : vector<8x1xf32>
    %c10_100 = arith.constant 10 : index
    %c0_101 = arith.constant 0 : index
    %c0_102 = arith.constant 0 : index
    %197 = vector.load %arg9[%c10_100, %c0_101, %c0_102] : memref<14x8x1xf32, #tpu.memory_space<vmem>>, vector<1x8x1xf32>
    %198 = vector.shape_cast %197 : vector<1x8x1xf32> to vector<8x1xf32>
    %199 = vector.shape_cast %196 : vector<8x1xf32> to vector<1x8x1xf32>
    tpu.vector_store %arg9[%c10_100, %c0_101, %c0_102], %199 {strides = array<i32>} : memref<14x8x1xf32, #tpu.memory_space<vmem>>, vector<1x8x1xf32>,
    %c11 = arith.constant 11 : index
    %c0_103 = arith.constant 0 : index
    %c0_104 = arith.constant 0 : index
    %200 = vector.load %arg9[%c11, %c0_103, %c0_104] : memref<14x8x1xf32, #tpu.memory_space<vmem>>, vector<1x8x1xf32>
    %201 = vector.shape_cast %200 : vector<1x8x1xf32> to vector<8x1xf32>
    %202 = arith.mulf %171, %187 : vector<8x8xf32>
    %cst_105 = arith.constant dense<0.000000e+00> : vector<8xf32>
    %203 = vector.multi_reduction <add>, %202, %cst_105 [1] : vector<8x8xf32> to vector<8xf32>
    %204 = vector.shape_cast %203 : vector<8xf32> to vector<8x1xf32>
    %205 = arith.addf %201, %204 : vector<8x1xf32>
    %c11_106 = arith.constant 11 : index
    %c0_107 = arith.constant 0 : index
    %c0_108 = arith.constant 0 : index
    %206 = vector.load %arg9[%c11_106, %c0_107, %c0_108] : memref<14x8x1xf32, #tpu.memory_space<vmem>>, vector<1x8x1xf32>
    %207 = vector.shape_cast %206 : vector<1x8x1xf32> to vector<8x1xf32>
    %208 = vector.shape_cast %205 : vector<8x1xf32> to vector<1x8x1xf32>
    tpu.vector_store %arg9[%c11_106, %c0_107, %c0_108], %208 {strides = array<i32>} : memref<14x8x1xf32, #tpu.memory_space<vmem>>, vector<1x8x1xf32>,
    %c0_i32_109 = arith.constant 0 : i32
    %209 = arith.cmpi eq, %arg1, %c0_i32_109 : i32
    %210 = arith.extui %209 : i1 to i32
    %c0_i32_110 = arith.constant 0 : i32
    %211 = arith.cmpi ne, %210, %c0_i32_110 : i32
    scf.if %211 {
      %c12_111 = arith.constant 12 : index
      %c0_112 = arith.constant 0 : index
      %c0_113 = arith.constant 0 : index
      %212 = vector.load %arg9[%c12_111, %c0_112, %c0_113] : memref<14x8x1xf32, #tpu.memory_space<vmem>>, vector<1x8x1xf32>
      %213 = vector.shape_cast %212 : vector<1x8x1xf32> to vector<8x1xf32>
      %c13_114 = arith.constant 13 : index
      %c0_115 = arith.constant 0 : index
      %c0_116 = arith.constant 0 : index
      %214 = vector.load %arg9[%c13_114, %c0_115, %c0_116] : memref<14x8x1xf32, #tpu.memory_space<vmem>>, vector<1x8x1xf32>
      %215 = vector.shape_cast %214 : vector<1x8x1xf32> to vector<8x1xf32>
      %c0_117 = arith.constant 0 : index
      %c0_118 = arith.constant 0 : index
      %c0_119 = arith.constant 0 : index
      %216 = vector.load %arg9[%c0_117, %c0_118, %c0_119] : memref<14x8x1xf32, #tpu.memory_space<vmem>>, vector<1x8x1xf32>
      %217 = vector.shape_cast %216 : vector<1x8x1xf32> to vector<8x1xf32>
      %218 = math.log %217 : vector<8x1xf32>
      %219 = arith.mulf %213, %218 : vector<8x1xf32>
      %c1_120 = arith.constant 1 : index
      %c0_121 = arith.constant 0 : index
      %c0_122 = arith.constant 0 : index
      %220 = vector.load %arg9[%c1_120, %c0_121, %c0_122] : memref<14x8x1xf32, #tpu.memory_space<vmem>>, vector<1x8x1xf32>
      %221 = vector.shape_cast %220 : vector<1x8x1xf32> to vector<8x1xf32>
      %222 = arith.subf %219, %221 : vector<8x1xf32>
      %cst_123 = arith.constant 0.000000e+00 : f32
      %223 = vector.broadcast %cst_123 : f32 to vector<8x1xf32>
      %224 = arith.cmpf ogt, %213, %223 : vector<8x1xf32>
      %cst_124 = arith.constant 0.000000e+00 : f32
      %225 = vector.broadcast %cst_124 : f32 to vector<8x1xf32>
      %226 = arith.select %224, %222, %225 : vector<8x1xi1>, vector<8x1xf32>
      %227 = vector.shape_cast %226 : vector<8x1xf32> to vector<1x8x1xf32>
      %cst_125 = arith.constant dense<0.000000e+00> : vector<1xf32>
      %228 = vector.multi_reduction <add>, %227, %cst_125 [1, 2] : vector<1x8x1xf32> to vector<1xf32>
      %229 = vector.shape_cast %228 : vector<1xf32> to vector<1x1x1xf32>
      %230 = vector.extract %229[0, 0, 0] : f32 from vector<1x1x1xf32>
      %c4_126 = arith.constant 4 : index
      %c0_127 = arith.constant 0 : index
      %c0_128 = arith.constant 0 : index
      %231 = vector.load %arg9[%c4_126, %c0_127, %c0_128] : memref<14x8x1xf32, #tpu.memory_space<vmem>>, vector<1x8x1xf32>
      %232 = vector.shape_cast %231 : vector<1x8x1xf32> to vector<8x1xf32>
      %233 = math.log %232 : vector<8x1xf32>
      %234 = arith.mulf %213, %233 : vector<8x1xf32>
      %c5_129 = arith.constant 5 : index
      %c0_130 = arith.constant 0 : index
      %c0_131 = arith.constant 0 : index
      %235 = vector.load %arg9[%c5_129, %c0_130, %c0_131] : memref<14x8x1xf32, #tpu.memory_space<vmem>>, vector<1x8x1xf32>
      %236 = vector.shape_cast %235 : vector<1x8x1xf32> to vector<8x1xf32>
      %237 = arith.subf %234, %236 : vector<8x1xf32>
      %cst_132 = arith.constant 0.000000e+00 : f32
      %238 = vector.broadcast %cst_132 : f32 to vector<8x1xf32>
      %239 = arith.cmpf ogt, %213, %238 : vector<8x1xf32>
      %cst_133 = arith.constant 0.000000e+00 : f32
      %240 = vector.broadcast %cst_133 : f32 to vector<8x1xf32>
      %241 = arith.select %239, %237, %240 : vector<8x1xi1>, vector<8x1xf32>
      %242 = vector.shape_cast %241 : vector<8x1xf32> to vector<1x8x1xf32>
      %cst_134 = arith.constant dense<0.000000e+00> : vector<1xf32>
      %243 = vector.multi_reduction <add>, %242, %cst_134 [1, 2] : vector<1x8x1xf32> to vector<1xf32>
      %244 = vector.shape_cast %243 : vector<1xf32> to vector<1x1x1xf32>
      %245 = vector.extract %244[0, 0, 0] : f32 from vector<1x1x1xf32>
      %c8_135 = arith.constant 8 : index
      %c0_136 = arith.constant 0 : index
      %c0_137 = arith.constant 0 : index
      %246 = vector.load %arg9[%c8_135, %c0_136, %c0_137] : memref<14x8x1xf32, #tpu.memory_space<vmem>>, vector<1x8x1xf32>
      %247 = vector.shape_cast %246 : vector<1x8x1xf32> to vector<8x1xf32>
      %248 = math.log %247 : vector<8x1xf32>
      %249 = arith.mulf %215, %248 : vector<8x1xf32>
      %c9_138 = arith.constant 9 : index
      %c0_139 = arith.constant 0 : index
      %c0_140 = arith.constant 0 : index
      %250 = vector.load %arg9[%c9_138, %c0_139, %c0_140] : memref<14x8x1xf32, #tpu.memory_space<vmem>>, vector<1x8x1xf32>
      %251 = vector.shape_cast %250 : vector<1x8x1xf32> to vector<8x1xf32>
      %252 = arith.subf %249, %251 : vector<8x1xf32>
      %cst_141 = arith.constant 0.000000e+00 : f32
      %253 = vector.broadcast %cst_141 : f32 to vector<8x1xf32>
      %254 = arith.cmpf ogt, %215, %253 : vector<8x1xf32>
      %cst_142 = arith.constant 0.000000e+00 : f32
      %255 = vector.broadcast %cst_142 : f32 to vector<8x1xf32>
      %256 = arith.select %254, %252, %255 : vector<8x1xi1>, vector<8x1xf32>
      %257 = vector.shape_cast %256 : vector<8x1xf32> to vector<1x8x1xf32>
      %cst_143 = arith.constant dense<0.000000e+00> : vector<1xf32>
      %258 = vector.multi_reduction <add>, %257, %cst_143 [1, 2] : vector<1x8x1xf32> to vector<1xf32>
      %259 = vector.shape_cast %258 : vector<1xf32> to vector<1x1x1xf32>
      %260 = vector.extract %259[0, 0, 0] : f32 from vector<1x1x1xf32>
      %c10_144 = arith.constant 10 : index
      %c0_145 = arith.constant 0 : index
      %c0_146 = arith.constant 0 : index
      %261 = vector.load %arg9[%c10_144, %c0_145, %c0_146] : memref<14x8x1xf32, #tpu.memory_space<vmem>>, vector<1x8x1xf32>
      %262 = vector.shape_cast %261 : vector<1x8x1xf32> to vector<8x1xf32>
      %263 = math.log %262 : vector<8x1xf32>
      %264 = arith.mulf %215, %263 : vector<8x1xf32>
      %c11_147 = arith.constant 11 : index
      %c0_148 = arith.constant 0 : index
      %c0_149 = arith.constant 0 : index
      %265 = vector.load %arg9[%c11_147, %c0_148, %c0_149] : memref<14x8x1xf32, #tpu.memory_space<vmem>>, vector<1x8x1xf32>
      %266 = vector.shape_cast %265 : vector<1x8x1xf32> to vector<8x1xf32>
      %267 = arith.subf %264, %266 : vector<8x1xf32>
      %cst_150 = arith.constant 0.000000e+00 : f32
      %268 = vector.broadcast %cst_150 : f32 to vector<8x1xf32>
      %269 = arith.cmpf ogt, %215, %268 : vector<8x1xf32>
      %cst_151 = arith.constant 0.000000e+00 : f32
      %270 = vector.broadcast %cst_151 : f32 to vector<8x1xf32>
      %271 = arith.select %269, %267, %270 : vector<8x1xi1>, vector<8x1xf32>
      %272 = vector.shape_cast %271 : vector<8x1xf32> to vector<1x8x1xf32>
      %cst_152 = arith.constant dense<0.000000e+00> : vector<1xf32>
      %273 = vector.multi_reduction <add>, %272, %cst_152 [1, 2] : vector<1x8x1xf32> to vector<1xf32>
      %274 = vector.shape_cast %273 : vector<1xf32> to vector<1x1x1xf32>
      %275 = vector.extract %274[0, 0, 0] : f32 from vector<1x1x1xf32>
      %276 = vector.shape_cast %215 : vector<8x1xf32> to vector<1x8x1xf32>
      %cst_153 = arith.constant dense<0.000000e+00> : vector<1xf32>
      %277 = vector.multi_reduction <add>, %276, %cst_153 [1, 2] : vector<1x8x1xf32> to vector<1xf32>
      %278 = vector.shape_cast %277 : vector<1xf32> to vector<1x1x1xf32>
      %279 = vector.extract %278[0, 0, 0] : f32 from vector<1x1x1xf32>
      %cst_154 = arith.constant 0.000000e+00 : f32
      %280 = vector.broadcast %cst_154 : f32 to vector<8x1xf32>
      %281 = arith.cmpf ogt, %213, %280 : vector<8x1xf32>
      %c3_155 = arith.constant 3 : index
      %c0_156 = arith.constant 0 : index
      %c0_157 = arith.constant 0 : index
      %282 = vector.load %arg9[%c3_155, %c0_156, %c0_157] : memref<14x8x1xf32, #tpu.memory_space<vmem>>, vector<1x8x1xf32>
      %283 = vector.shape_cast %282 : vector<1x8x1xf32> to vector<8x1xf32>
      %c2_158 = arith.constant 2 : index
      %c0_159 = arith.constant 0 : index
      %c0_160 = arith.constant 0 : index
      %284 = vector.load %arg9[%c2_158, %c0_159, %c0_160] : memref<14x8x1xf32, #tpu.memory_space<vmem>>, vector<1x8x1xf32>
      %285 = vector.shape_cast %284 : vector<1x8x1xf32> to vector<8x1xf32>
      %286 = arith.cmpf oge, %283, %285 : vector<8x1xf32>
      %287 = arith.andi %281, %286 : vector<8x1xi1>
      %288 = arith.extui %287 : vector<8x1xi1> to vector<8x1xi32>
      %289 = arith.sitofp %288 : vector<8x1xi32> to vector<8x1xf32>
      %290 = vector.shape_cast %289 : vector<8x1xf32> to vector<1x8x1xf32>
      %cst_161 = arith.constant dense<0.000000e+00> : vector<1xf32>
      %291 = vector.multi_reduction <add>, %290, %cst_161 [1, 2] : vector<1x8x1xf32> to vector<1xf32>
      %292 = vector.shape_cast %291 : vector<1xf32> to vector<1x1x1xf32>
      %293 = vector.extract %292[0, 0, 0] : f32 from vector<1x1x1xf32>
      %cst_162 = arith.constant 0.000000e+00 : f32
      %294 = vector.broadcast %cst_162 : f32 to vector<8x1xf32>
      %295 = arith.cmpf ogt, %213, %294 : vector<8x1xf32>
      %c7_163 = arith.constant 7 : index
      %c0_164 = arith.constant 0 : index
      %c0_165 = arith.constant 0 : index
      %296 = vector.load %arg9[%c7_163, %c0_164, %c0_165] : memref<14x8x1xf32, #tpu.memory_space<vmem>>, vector<1x8x1xf32>
      %297 = vector.shape_cast %296 : vector<1x8x1xf32> to vector<8x1xf32>
      %c6_166 = arith.constant 6 : index
      %c0_167 = arith.constant 0 : index
      %c0_168 = arith.constant 0 : index
      %298 = vector.load %arg9[%c6_166, %c0_167, %c0_168] : memref<14x8x1xf32, #tpu.memory_space<vmem>>, vector<1x8x1xf32>
      %299 = vector.shape_cast %298 : vector<1x8x1xf32> to vector<8x1xf32>
      %300 = arith.cmpf oge, %297, %299 : vector<8x1xf32>
      %301 = arith.andi %295, %300 : vector<8x1xi1>
      %302 = arith.extui %301 : vector<8x1xi1> to vector<8x1xi32>
      %303 = arith.sitofp %302 : vector<8x1xi32> to vector<8x1xf32>
      %304 = vector.shape_cast %303 : vector<8x1xf32> to vector<1x8x1xf32>
      %cst_169 = arith.constant dense<0.000000e+00> : vector<1xf32>
      %305 = vector.multi_reduction <add>, %304, %cst_169 [1, 2] : vector<1x8x1xf32> to vector<1xf32>
      %306 = vector.shape_cast %305 : vector<1xf32> to vector<1x1x1xf32>
      %307 = vector.extract %306[0, 0, 0] : f32 from vector<1x1x1xf32>
      %308 = tpu.iota {dimensions = array<i32: 0>} : vector<8x128xi32>
      %cst_170 = arith.constant 0.000000e+00 : f32
      %309 = vector.broadcast %cst_170 : f32 to vector<8x128xf32>
      %c0_i32_171 = arith.constant 0 : i32
      %310 = vector.broadcast %c0_i32_171 : i32 to vector<8x128xi32>
      %311 = arith.cmpi eq, %308, %310 : vector<8x128xi32>
      %312 = vector.broadcast %230 : f32 to vector<8x128xf32>
      %313 = arith.select %311, %312, %309 : vector<8x128xi1>, vector<8x128xf32>
      %c1_i32 = arith.constant 1 : i32
      %314 = vector.broadcast %c1_i32 : i32 to vector<8x128xi32>
      %315 = arith.cmpi eq, %308, %314 : vector<8x128xi32>
      %316 = vector.broadcast %245 : f32 to vector<8x128xf32>
      %317 = arith.select %315, %316, %313 : vector<8x128xi1>, vector<8x128xf32>
      %c2_i32 = arith.constant 2 : i32
      %318 = vector.broadcast %c2_i32 : i32 to vector<8x128xi32>
      %319 = arith.cmpi eq, %308, %318 : vector<8x128xi32>
      %320 = vector.broadcast %260 : f32 to vector<8x128xf32>
      %321 = arith.select %319, %320, %317 : vector<8x128xi1>, vector<8x128xf32>
      %c3_i32 = arith.constant 3 : i32
      %322 = vector.broadcast %c3_i32 : i32 to vector<8x128xi32>
      %323 = arith.cmpi eq, %308, %322 : vector<8x128xi32>
      %324 = vector.broadcast %275 : f32 to vector<8x128xf32>
      %325 = arith.select %323, %324, %321 : vector<8x128xi1>, vector<8x128xf32>
      %c4_i32 = arith.constant 4 : i32
      %326 = vector.broadcast %c4_i32 : i32 to vector<8x128xi32>
      %327 = arith.cmpi eq, %308, %326 : vector<8x128xi32>
      %328 = vector.broadcast %279 : f32 to vector<8x128xf32>
      %329 = arith.select %327, %328, %325 : vector<8x128xi1>, vector<8x128xf32>
      %c5_i32 = arith.constant 5 : i32
      %330 = vector.broadcast %c5_i32 : i32 to vector<8x128xi32>
      %331 = arith.cmpi eq, %308, %330 : vector<8x128xi32>
      %332 = vector.broadcast %293 : f32 to vector<8x128xf32>
      %333 = arith.select %331, %332, %329 : vector<8x128xi1>, vector<8x128xf32>
      %c6_i32 = arith.constant 6 : i32
      %334 = vector.broadcast %c6_i32 : i32 to vector<8x128xi32>
      %335 = arith.cmpi eq, %308, %334 : vector<8x128xi32>
      %336 = vector.broadcast %307 : f32 to vector<8x128xf32>
      %337 = arith.select %335, %336, %333 : vector<8x128xi1>, vector<8x128xf32>
      %c0_172 = arith.constant 0 : index
      %c0_173 = arith.constant 0 : index
      %c0_174 = arith.constant 0 : index
      %338 = vector.load %arg8[%c0_172, %c0_173, %c0_174] : memref<1x8x128xf32, #tpu.memory_space<vmem>>, vector<1x8x128xf32>
      %339 = vector.shape_cast %338 : vector<1x8x128xf32> to vector<8x128xf32>
      %340 = vector.shape_cast %337 : vector<8x128xf32> to vector<1x8x128xf32>
      tpu.vector_store %arg8[%c0_172, %c0_173, %c0_174], %340 {strides = array<i32>} : memref<1x8x128xf32, #tpu.memory_space<vmem>>, vector<1x8x128xf32>,
    } else {
    }
    return
  }
  func.func @transform_0(%arg0: i32, %arg1: i32) -> (i32, i32) {
    %c0_i32 = arith.constant 0 : i32
    %c0_i32_0 = arith.constant 0 : i32
    return %arg0, %c0_i32 : i32, i32
  }
  func.func @transform_1(%arg0: i32, %arg1: i32) -> (i32, i32) {
    %c0_i32 = arith.constant 0 : i32
    %c0_i32_0 = arith.constant 0 : i32
    return %c0_i32, %arg1 : i32, i32
  }
  func.func @transform_2(%arg0: i32, %arg1: i32) -> (i32, i32) {
    %c0_i32 = arith.constant 0 : i32
    %c0_i32_0 = arith.constant 0 : i32
    return %arg0, %c0_i32 : i32, i32
  }
  func.func @transform_3(%arg0: i32, %arg1: i32) -> (i32, i32) {
    %c0_i32 = arith.constant 0 : i32
    %c0_i32_0 = arith.constant 0 : i32
    return %arg0, %c0_i32 : i32, i32
  }
  func.func @transform_4(%arg0: i32, %arg1: i32) -> (i32, i32) {
    %c0_i32 = arith.constant 0 : i32
    %c0_i32_0 = arith.constant 0 : i32
    return %c0_i32, %arg1 : i32, i32
  }
  func.func @transform_5(%arg0: i32, %arg1: i32) -> (i32, i32) {
    %c0_i32 = arith.constant 0 : i32
    %c0_i32_0 = arith.constant 0 : i32
    return %c0_i32, %arg1 : i32, i32
  }
  func.func @transform_6(%arg0: i32, %arg1: i32) -> (i32, i32, i32) {
    %c0_i32 = arith.constant 0 : i32
    %c0_i32_0 = arith.constant 0 : i32
    %c0_i32_1 = arith.constant 0 : i32
    return %arg0, %c0_i32, %c0_i32_0 : i32, i32, i32
  }
}

</mosaic_0001>

<bundles_post_ra>
// kernel: tpu_custom_call.1
= control target key start
LH: loop header
LB: loop body
LE: loop exit
PB: predicated region body
PF: predicated region fallthrough
CT: control target
= control target key end

     0   :  { %v1042_v3 = vmov 0.0|0.0   ;;  %vm1043_vm0 = vmmov 0   ;;  %v1044_v11 = vmov 0.0   ;;  %v1045_v13 = vmov 0   ;;  %s1423_s0 = inlined_call_operand.vmem [shape: s32[8,1], index: 0, kind: input, shape index: {}]   ;;  %s1424_s1 = inlined_call_operand.vmem [shape: s32[1,8], index: 1, kind: input, shape index: {}]   ;;  %s1425_s2 = inlined_call_operand.vmem [shape: f32[8,128], index: 2, kind: input, shape index: {}]   ;;  %s1426_s3 = inlined_call_operand.vmem [shape: f32[8,128], index: 3, kind: input, shape index: {}]   ;;  %s1427_s4 = inlined_call_operand.vmem [shape: f32[128,8], index: 4, kind: input, shape index: {}]   ;;  %s1428_s5 = inlined_call_operand.vmem [shape: f32[128,8], index: 5, kind: input, shape index: {}]   ;;  %s1429_s6 = inlined_call_operand.hbm [shape: f32[1,8,128], index: 6, kind: output, shape index: {}]  }
   0x1   :  { %v73_v0 = vld [vmem:[%s1428_s5] sm:$0xff]  ;;  %v74_v1 = vld [vmem:[%s1428_s5 + $0x8] sm:$0xff]  ;;  %885 = vmatprep.subr.bf16.mxu0 %v1042_v3  ;;  %909 = vmatprep.subr.bf16.mxu1 %v1042_v3  ;;  %v75_v6 = vld [vmem:[%s1428_s5 + $0x10] sm:$0xff] }
   0x2   :  { %v57_v2 = vld [vmem:[%s1427_s4] sm:$0xff]  ;;  %v1094_v4 = vpack.c.bf16 %v74_v1, %v73_v0  ;;  %v58_v5 = vld [vmem:[%s1427_s4 + $0x8] sm:$0xff]  ;;  %v76_v7 = vld [vmem:[%s1428_s5 + $0x18] sm:$0xff]  ;;  %777 = vmatprep.mubr.msk.f32.mxu0 %vm1043_vm0, %v1044_v11  ;;  %812 = vmatprep.mubr.msk.f32.mxu1 %vm1043_vm0, %v1044_v11 }
   0x3   :  { %v1105_v8 = vpack.c.bf16 %v58_v5, %v57_v2  ;;  %v59_v9 = vld [vmem:[%s1427_s4 + $0x10] sm:$0xff]  ;;  %v60_v10 = vld [vmem:[%s1427_s4 + $0x18] sm:$0xff]  ;;  %v1118_v12 = vpack.c.bf16 %v76_v7, %v75_v6  ;;  %1001 = vset.pattern.permute.xlu0 %v1045_v13  ;;  %v77_v15 = vld [vmem:[%s1428_s5 + $0x20] sm:$0xff] }
   0x4   :  { %887 = vmatpush3.bf16.msra.mxu0 %v1094_v4  ;;  %v1122_v14 = vpack.c.bf16 %v60_v10, %v59_v9  ;;  %v78_v16 = vld [vmem:[%s1428_s5 + $0x28] sm:$0xff]  ;;  %v61_v17 = vld [vmem:[%s1427_s4 + $0x20] sm:$0xff]  ;;  %v79_v21 = vld [vmem:[%s1428_s5 + $0x30] sm:$0xff] }
   0x5   :  { %911 = vmatpush3.bf16.msra.mxu1 %v1105_v8  ;;  %888 = vmatprep.subr.bf16.mxu0 %v1042_v3  ;;  %v62_v18 = vld [vmem:[%s1427_s4 + $0x28] sm:$0xff]  ;;  %v1138_v19 = vpack.c.bf16 %v78_v16, %v77_v15  ;;  %v80_v22 = vld [vmem:[%s1428_s5 + $0x38] sm:$0xff]  ;;  %v63_v23 = vld [vmem:[%s1427_s4 + $0x30] sm:$0xff] }
   0x6   :  { %912 = vmatprep.subr.bf16.mxu1 %v1042_v3  ;;  %v1142_v20 = vpack.c.bf16 %v62_v18, %v61_v17  ;;  %v64_v24 = vld [vmem:[%s1427_s4 + $0x38] sm:$0xff]  ;;  %v1158_v25 = vpack.c.bf16 %v80_v22, %v79_v21  ;;  %v53_v26 = vld [vmem:[%s1423_s0] sm:$0xff]  ;;  %v82_v29 = vld [vmem:[%s1428_s5 + $0x48] sm:$0xff] }
   0x7   :  { %v1165_v27 = vpack.c.bf16 %v64_v24, %v63_v23  ;;  %v81_v28 = vld [vmem:[%s1428_s5 + $0x40] sm:$0xff]  ;;  %v66_v31 = vld [vmem:[%s1427_s4 + $0x48] sm:$0xff]  ;;  %165 = vperm.xlu0 %1001, %v53_v26  }
   0x8   :  { %890 = vmatpush3.bf16.msra.mxu0 %v1118_v12  ;;  %v65_v30 = vld [vmem:[%s1427_s4 + $0x40] sm:$0xff] }
   0x9   :  { %914 = vmatpush3.bf16.msra.mxu1 %v1122_v14  ;;  %891 = vmatprep.subr.bf16.mxu0 %v1042_v3 }
   0xa   :  { %915 = vmatprep.subr.bf16.mxu1 %v1042_v3 }
   0xc   :  { %893 = vmatpush3.bf16.msra.mxu0 %v1138_v19 }
   0xd   :  { %917 = vmatpush3.bf16.msra.mxu1 %v1142_v20  ;;  %894 = vmatprep.subr.bf16.mxu0 %v1042_v3 }
   0xe   :  { %918 = vmatprep.subr.bf16.mxu1 %v1042_v3 }
   0xf   :  { %11 = vsyncpa [#allocation4], 0  ;;  %v898_v32 = vpack.c.bf16 %v82_v29, %v81_v28  ;;  %v922_v33 = vpack.c.bf16 %v66_v31, %v65_v30  ;;  %v83_v34 = vld [vmem:[%s1428_s5 + $0x50] sm:$0xff]  ;;  %v84_v35 = vld [vmem:[%s1428_s5 + $0x58] sm:$0xff]  ;;  %v159_v54 = vlaneseq  ;;  %vm181_vm5 = vcmask 64512   ;;  %s1047_s19 = smov [#allocation3]  }
  0x10   :  { %896 = vmatpush3.bf16.msra.mxu0 %v1158_v25  ;;  %v67_v36 = vld [vmem:[%s1427_s4 + $0x50] sm:$0xff]  ;;  %v68_v37 = vld [vmem:[%s1427_s4 + $0x58] sm:$0xff]  ;;  %v901_v38 = vpack.c.bf16 %v84_v35, %v83_v34  ;;  %v85_v40 = vld [vmem:[%s1428_s5 + $0x60] sm:$0xff]  ;;  %vm30_vm8 = vcmask 7168   ;;  %v1046_v22 = vmov -1e+30  }
  0x11   :  { %920 = vmatpush3.bf16.msra.mxu1 %v1165_v27  ;;  %897 = vmatprep.subr.bf16.mxu0 %v1042_v3  ;;  %v925_v39 = vpack.c.bf16 %v68_v37, %v67_v36  ;;  %v86_v41 = vld [vmem:[%s1428_s5 + $0x68] sm:$0xff]  ;;  %v69_v42 = vld [vmem:[%s1427_s4 + $0x60] sm:$0xff]  ;;  %v87_v46 = vld [vmem:[%s1428_s5 + $0x70] sm:$0xff]  ;;  %v1260_v55 = vshrl.u32 %v159_v54, 7  ;;  %v160_v56 = vand.u32 127, %v159_v54  ;;  %43 = vst.msk [vmem:[#allocation2 + $0x60] sm:$0xff] %vm30_vm8, %v1044_v11 }
  0x12   :  { %921 = vmatprep.subr.bf16.mxu1 %v1042_v3  ;;  %v70_v43 = vld [vmem:[%s1427_s4 + $0x68] sm:$0xff]  ;;  %v904_v44 = vpack.c.bf16 %v86_v41, %v85_v40  ;;  %v88_v47 = vld [vmem:[%s1428_s5 + $0x78] sm:$0xff]  ;;  %v71_v48 = vld [vmem:[%s1427_s4 + $0x70] sm:$0xff]  ;;  %31 = vst.msk [vmem:[#allocation2] sm:$0xff] %vm30_vm8, %v1044_v11  ;;  %s662_s20 = sshll.u32 %s1047_s19, 4  ;;  %s663_s20 = int_to_ptr.vmem [resolvable:$true] %s662_s20 }
  0x13   :  { %v928_v45 = vpack.c.bf16 %v70_v43, %v69_v42  ;;  %v72_v49 = vld [vmem:[%s1427_s4 + $0x78] sm:$0xff]  ;;  %v907_v50 = vpack.c.bf16 %v88_v47, %v87_v46  ;;  %v55_v52 = vld [vmem:[%s1425_s2] sm:$0xff]  ;;  %vm397_vm1 = vcmp.ne.s32.totalorder %v160_v56, %v1260_v55  ;;  %vm163_vm2 = vcmp.lt.s32.totalorder %v160_v56, 8  ;;  %32 = vst.msk [vmem:[#allocation2 + $0x8] sm:$0xff] %vm30_vm8, %v1044_v11  ;;  %33 = vst.msk [vmem:[#allocation2 + $0x10] sm:$0xff] %vm30_vm8, %v1044_v11  ;;  %s1018_s23 = scalar_lea.vmem %s663_s20, 128  ;;  %p1023_p1 = scmp.lt.s32.totalorder %s663_s20, %s663_s20 }
  0x14   :  { %899 = vmatpush3.bf16.msra.mxu0 %v898_v32  ;;  %v931_v51 = vpack.c.bf16 %v72_v49, %v71_v48  ;;  %v56_v53 = vld [vmem:[%s1426_s3] sm:$0xff]  ;;  %vm1267_vm3 = vmand %vm163_vm2, %vm397_vm1  ;;  %34 = vst.msk [vmem:[#allocation2 + $0x18] sm:$0xff] %vm30_vm8, %v1044_v11  ;;  %v672_v10 = vsel %vm163_vm2, 1.0, %v1044_v11  ;;  %vm634_vm15 = vcmp.eq.s32.totalorder %v1260_v55, 0  ;;  %vm640_vm1 = vcmp.eq.s32.totalorder %v1260_v55, 2  ;;  %p1019_p0 = scmp.ne.s32.totalorder %s663_s20, %s1018_s23  ;;  %p1024_p2 = scmp.lt.s32.totalorder %s1018_s23, %s1018_s23 }
  0x15   :  { %923 = vmatpush3.bf16.msra.mxu1 %v922_v33  ;;  %900 = vmatprep.subr.bf16.mxu0 %v1042_v3  ;;  %v670_v57 = vld [vmem:[%s1424_s1] ss:$0 sm:$0xff]  ;;  %35 = vst.msk [vmem:[#allocation2 + $0x20] sm:$0xff] %vm30_vm8, %v1044_v11  ;;  %36 = vst.msk [vmem:[#allocation2 + $0x28] sm:$0xff] %vm30_vm8, %v1044_v11  ;;  %v674_v34 = vsel %vm1267_vm3, 1.0, %v1044_v11 }
  0x16   :  { %924 = vmatprep.subr.bf16.mxu1 %v1042_v3  ;;  %37 = vst.msk [vmem:[#allocation2 + $0x30] sm:$0xff] %vm30_vm8, %v1044_v11  ;;  %38 = vst.msk [vmem:[#allocation2 + $0x38] sm:$0xff] %vm30_vm8, %v1044_v11  ;;  %p1025_p3 = por %p1024_p2, %p1023_p1 }
  0x17   :  { %39 = vst.msk [vmem:[#allocation2 + $0x40] sm:$0xff] %vm30_vm8, %v1044_v11  ;;  %40 = vst.msk [vmem:[#allocation2 + $0x48] sm:$0xff] %vm30_vm8, %v1044_v11 }
  0x18   :  { %902 = vmatpush3.bf16.msra.mxu0 %v901_v38  ;;  %41 = vst.msk [vmem:[#allocation2 + $0x50] sm:$0xff] %vm30_vm8, %v1044_v11  ;;  %42 = vst.msk [vmem:[#allocation2 + $0x58] sm:$0xff] %vm30_vm8, %v1044_v11  ;;  %v213_v31 = vld [vmem:[#allocation2 + $0x60] sm:$0xff]  ;;  %p1026_p4 = pnand %p1025_p3, %p1019_p0 }
  0x19   :  { %926 = vmatpush3.bf16.msra.mxu1 %v925_v39  ;;  %903 = vmatprep.subr.bf16.mxu0 %v1042_v3  ;;  %44 = vst.msk [vmem:[#allocation2 + $0x68] sm:$0xff] %vm30_vm8, %v1044_v11  ;;  %46 = vst.msk [vmem:[#allocation2 + $0x10] sm:$0xff] %vm30_vm8, %v1046_v22  ;;  %v175_v56 = vld [vmem:[#allocation2] sm:$0xff] }
  0x1a   :  { %927 = vmatprep.subr.bf16.mxu1 %v1042_v3  ;;  %48 = vst.msk [vmem:[#allocation2 + $0x18] sm:$0xff] %vm30_vm8, %v1046_v22  ;;  %50 = vst.msk [vmem:[#allocation2 + $0x30] sm:$0xff] %vm30_vm8, %v1046_v22  ;;  %v189_v49 = vld [vmem:[#allocation2 + $0x8] sm:$0xff] }
  0x1b   :  { %52 = vst.msk [vmem:[#allocation2 + $0x38] sm:$0xff] %vm30_vm8, %v1046_v22 }
  0x1c   :  { %905 = vmatpush3.bf16.msra.mxu0 %v904_v44 }
  0x1d   :  { %929 = vmatpush3.bf16.msra.mxu1 %v928_v45  ;;  %906 = vmatprep.subr.bf16.mxu0 %v1042_v3 }
  0x1e   :  { %930 = vmatprep.subr.bf16.mxu1 %v1042_v3 }
  0x20   :  { %908 = vmatpush3.bf16.msra.mxu0 %v907_v50 }
  0x21   :  { %932 = vmatpush3.bf16.msra.mxu1 %v931_v51  ;;  %933 = vmatprep.subr.bf16.mxu0 %v1042_v3 }
  0x22   :  { %957 = vmatprep.subr.bf16.mxu1 %v1042_v3 }
  0x23   :  { %778 = vmatmul.mubr.f32.vlgmr.msra.gmra.mrb[0].mxu0 %v55_v52 }
  0x24   :  { %813 = vmatmul.mubr.f32.vlgmr.msra.gmra.mrb[0].mxu1 %v56_v53  ;;  %935 = vmatpush3.bf16.msra.mxu0 %v1105_v8 }
  0x25   :  { %959 = vmatpush3.bf16.msra.mxu1 %v1094_v4  ;;  %936 = vmatprep.subr.bf16.mxu0 %v1042_v3 }
  0x26   :  { %960 = vmatprep.subr.bf16.mxu1 %v1042_v3  ;;  %847 = vmatprep.mubr.msk.f32.mxu0 %vm1043_vm0, %v1044_v11 }
  0x27   :  { %882 = vmatprep.mubr.msk.f32.mxu1 %vm1043_vm0, %v1044_v11  ;;  %vm637_vm0 = vcmp.eq.s32.totalorder %v1260_v55, 1 }
  0x28   :  { %938 = vmatpush3.bf16.msra.mxu0 %v1122_v14 }
  0x29   :  { %962 = vmatpush3.bf16.msra.mxu1 %v1118_v12  ;;  %939 = vmatprep.subr.bf16.mxu0 %v1042_v3 }
  0x2a   :  { %963 = vmatprep.subr.bf16.mxu1 %v1042_v3 }
  0x2c   :  { %941 = vmatpush3.bf16.msra.mxu0 %v1142_v20 }
  0x2d   :  { %965 = vmatpush3.bf16.msra.mxu1 %v1138_v19  ;;  %942 = vmatprep.subr.bf16.mxu0 %v1042_v3 }
  0x2e   :  { %966 = vmatprep.subr.bf16.mxu1 %v1042_v3 }
  0x30   :  { %944 = vmatpush3.bf16.msra.mxu0 %v1165_v27 }
  0x31   :  { %968 = vmatpush3.bf16.msra.mxu1 %v1158_v25  ;;  %945 = vmatprep.subr.bf16.mxu0 %v1042_v3 }
  0x32   :  { %969 = vmatprep.subr.bf16.mxu1 %v1042_v3 }
  0x34   :  { %947 = vmatpush3.bf16.msra.mxu0 %v922_v33 }
  0x35   :  { %971 = vmatpush3.bf16.msra.mxu1 %v898_v32  ;;  %948 = vmatprep.subr.bf16.mxu0 %v1042_v3 }
  0x36   :  { %972 = vmatprep.subr.bf16.mxu1 %v1042_v3 }
  0x38   :  { %950 = vmatpush3.bf16.msra.mxu0 %v925_v39 }
  0x39   :  { %974 = vmatpush3.bf16.msra.mxu1 %v901_v38  ;;  %951 = vmatprep.subr.bf16.mxu0 %v1042_v3 }
  0x3a   :  { %975 = vmatprep.subr.bf16.mxu1 %v1042_v3 }
  0x3c   :  { %953 = vmatpush3.bf16.msra.mxu0 %v928_v45 }
  0x3d   :  { %977 = vmatpush3.bf16.msra.mxu1 %v904_v44  ;;  %954 = vmatprep.subr.bf16.mxu0 %v1042_v3 }
  0x3e   :  { %978 = vmatprep.subr.bf16.mxu1 %v1042_v3 }
  0x40   :  { %956 = vmatpush3.bf16.msra.mxu0 %v931_v51 }
  0x41   :  { %980 = vmatpush3.bf16.msra.mxu1 %v907_v50 }
  0x43   :  { %848 = vmatmul.mubr.f32.vlgmr.msra.gmra.mrb[2].mxu0 %v55_v52  ;;  %v423_v52 = vld [vmem:[#allocation2 + $0x68] sm:$0xff] }
  0x44   :  { %883 = vmatmul.mubr.f32.vlgmr.msra.gmra.mrb[2].mxu1 %v56_v53 }
  0x86   :  { %v166_v59 = vpop.permute.xlu0 %165 }
  0x87   :  { %vm171_vm4 = vcmp.eq.s32.totalorder %v166_v59, %v670_v57  ;;  %v290_v57 = vld [vmem:[#allocation2 + $0x20] sm:$0xff] }
  0x88   :  { %vm1272_vm6 = vmand %vm171_vm4, %vm163_vm2 }
  0x89   :  { %vm1278_vm7 = vmand %vm171_vm4, %vm1267_vm3  ;;  %v1285_v62 = vsel %vm1272_vm6, 1.0, %v1044_v11  ;;  %vm646_vm3 = vcmp.eq.s32.totalorder %v1260_v55, 4  ;;  %vm649_vm4 = vcmp.eq.s32.totalorder %v1260_v55, 5 }
  0x8a   :  { %v214_v63 = vsel %vm181_vm5, %v1285_v62, 0.0  ;;  %v673_v5 = vsel %vm1278_vm7, 1.0, %v1044_v11 }
  0x8b   :  { %215 = vadd.xlane.f32.xlu1 %v214_v63  ;;  %v424_v9 = vsel %vm181_vm5, %v673_v5, 0.0  ;;  %v197_v63 = vld [vmem:[#allocation2 + $0x10] sm:$0xff] }
  0xf6   :  { %v1317_v0 = vpop.f32.mrb[0].mxu0 }
  0xf7   :  { %v176_v1 = vmul.f32 1.442695, %v1317_v0  ;;  %v779_v2 = vpop.f32.mrb[1].mxu0  ;;  %v1320_v3 = vpop.f32.mrb[0].mxu1  ;;  %v190_v4 = vmul.f32 %v1285_v62, %v1317_v0  ;;  %v198_v18 = vsel %vm163_vm2, %v1317_v0, -1e+30 }
  0xf8   :  { %v291_v6 = vmul.f32 1.442695, %v1320_v3  ;;  %v814_v7 = vpop.f32.mrb[1].mxu1  ;;  %v199_v19 = vsel %vm181_vm5, %v198_v18, -inf  ;;  %v309_v20 = vsel %vm163_vm2, %v1320_v3, -1e+30  ;;  %v301_v41 = vmul.f32 %v1285_v62, %v1320_v3 }
  0xf9   :  { %1002 = vpow2.f32 %v176_v1  ;;  %v191_v8 = vsel %vm181_vm5, %v190_v4, 0.0  ;;  %v310_v21 = vsel %vm181_vm5, %v309_v20, -inf  ;;  %v206_v45 = vsel %vm1272_vm6, %v1317_v0, -1e+30  ;;  %v500_v20 = vld [vmem:[#allocation2 + $0x50] sm:$0xff] }
  0xfa   :  { %1004 = vpow2.f32 %v291_v6  ;;  %192 = vadd.xlane.f32.xlu1 %v191_v8  ;;  %v302_v42 = vsel %vm181_vm5, %v301_v41, 0.0  ;;  %v207_v46 = vsel %vm181_vm5, %v206_v45, -inf  ;;  %v317_v47 = vsel %vm1272_vm6, %v1320_v3, -1e+30  ;;  %v308_v3 = vld [vmem:[#allocation2 + $0x30] sm:$0xff]  ;;  %v316_v45 = vld [vmem:[#allocation2 + $0x38] sm:$0xff] }
  0xfb   :  { %v318_v48 = vsel %vm181_vm5, %v317_v47, -inf  ;;  %vm643_vm2 = vcmp.eq.s32.totalorder %v1260_v55, 3 }
  0xfe   :  { %425 = vadd.xlane.f32.xlu1 %v424_v9 }
 0x103   :  { %v1003_v12 = vpop.eup %1002 }
 0x104   :  { %v1005_v13 = vpop.eup %1004  ;;  %v180_v14 = vmul.f32 %v1003_v12, %v672_v10 }
 0x105   :  { %v293_v15 = vmul.f32 %v1005_v13, %v672_v10 }
 0x106   :  { %v182_v16 = vsel %vm181_vm5, %v180_v14, 0.0 }
 0x107   :  { %183 = vadd.xlane.f32.xlu0 %v182_v16  ;;  %v294_v17 = vsel %vm181_vm5, %v293_v15, 0.0 }
 0x108   :  { %295 = vadd.xlane.f32.xlu1 %v294_v17  ;;  %v403_v17 = vld [vmem:[#allocation2 + $0x40] sm:$0xff] }
 0x10b   :  { %200 = vmax.xlane.f32.xlu0 %v199_v19 }
 0x10f   :  { %311 = vmax.xlane.f32.xlu0 %v310_v21 }
 0x116   :  { %v389_v23 = vpop.f32.mrb[2].mxu0 }
 0x117   :  { %v404_v24 = vmul.f32 1.442695, %v389_v23  ;;  %v416_v25 = vmul.f32 %v673_v5, %v389_v23  ;;  %v495_v26 = vpop.f32.mrb[2].mxu1  ;;  %v849_v27 = vpop.f32.mrb[3].mxu0  ;;  %v300_v23 = vld [vmem:[#allocation2 + $0x28] sm:$0xff] }
 0x118   :  { %v501_v28 = vmul.f32 1.442695, %v495_v26  ;;  %v511_v29 = vmul.f32 %v673_v5, %v495_v26  ;;  %v884_v30 = vpop.f32.mrb[3].mxu1  ;;  %v216_v32 = vpop.xlane.xlu1 %215  ;;  %v415_v27 = vld [vmem:[#allocation2 + $0x48] sm:$0xff] }
 0x119   :  { %1006 = vpow2.f32 %v404_v24  ;;  %v217_v33 = vadd.f32 %v216_v32, %v213_v31  ;;  %v417_v43 = vsel %vm181_vm5, %v416_v25, 0.0  ;;  %v510_v32 = vld [vmem:[#allocation2 + $0x58] sm:$0xff] }
 0x11a   :  { %1008 = vpow2.f32 %v501_v28  ;;  %v512_v44 = vsel %vm181_vm5, %v511_v29, 0.0 }
 0x11b   :  { %218 = vst.msk [vmem:[#allocation2 + $0x60] sm:$0xff] %vm30_vm8, %v217_v33 }
 0x122   :  { %v1373_v8 = vld [vmem:[#allocation2 + $0x60] sm:$0xff] }
 0x123   :  { %v1007_v35 = vpop.eup %1006  ;;  %vm528_vm9 = vcmp.gt.f32.partialorder %v1373_v8, 0.0 }
 0x124   :  { %v1009_v36 = vpop.eup %1008  ;;  %v408_v37 = vmul.f32 %v1007_v35, %v674_v34 }
 0x125   :  { %v503_v38 = vmul.f32 %v1009_v36, %v674_v34 }
 0x126   :  { %v409_v39 = vsel %vm181_vm5, %v408_v37, 0.0  ;;  %v205_v37 = vld [vmem:[#allocation2 + $0x18] sm:$0xff] }
 0x127   :  { %410 = vadd.xlane.f32.xlu1 %v409_v39  ;;  %v504_v40 = vsel %vm181_vm5, %v503_v38, 0.0  ;;  %vm652_vm5 = vcmp.eq.s32.totalorder %v1260_v55, 6 }
 0x12b   :  { %505 = vadd.xlane.f32.xlu1 %v504_v40 }
 0x12f   :  { %303 = vadd.xlane.f32.xlu1 %v302_v42 }
 0x133   :  { %418 = vadd.xlane.f32.xlu1 %v417_v43 }
 0x137   :  { %513 = vadd.xlane.f32.xlu1 %v512_v44 }
 0x13b   :  { %208 = vmax.xlane.f32.xlu1 %v207_v46 }
 0x13f   :  { %319 = vmax.xlane.f32.xlu1 %v318_v48 }
 0x187   :  { %v193_v50 = vpop.xlane.xlu1 %192 }
 0x188   :  { %v194_v51 = vadd.f32 %v193_v50, %v189_v49 }
 0x18a   :  { %195 = vst.msk [vmem:[#allocation2 + $0x8] sm:$0xff] %vm30_vm8, %v194_v51 }
 0x18b   :  { %v426_v53 = vpop.xlane.xlu1 %425 }
 0x18c   :  { %v427_v54 = vadd.f32 %v426_v53, %v423_v52 }
 0x18e   :  { %428 = vst.msk [vmem:[#allocation2 + $0x68] sm:$0xff] %vm30_vm8, %v427_v54 }
 0x191   :  { %v526_v12 = vld [vmem:[#allocation2 + $0x8] sm:$0xff] }
 0x194   :  { %v184_v58 = vpop.xlane.xlu0 %183 }
 0x195   :  { %v185_v59 = vadd.f32 %v184_v58, %v175_v56  ;;  %v296_v61 = vpop.xlane.xlu1 %295  ;;  %v1365_v60 = vld [vmem:[#allocation2 + $0x68] sm:$0xff] }
 0x196   :  { %v297_v62 = vadd.f32 %v296_v61, %v290_v57  ;;  %v592_v0 = vsel %vm30_vm8, %v1365_v60, 0.0  ;;  %vm563_vm10 = vcmp.gt.f32.partialorder %v1365_v60, 0.0 }
 0x197   :  { %187 = vst.msk [vmem:[#allocation2] sm:$0xff] %vm30_vm8, %v185_v59  ;;  %593 = vadd.xlane.f32.xlu0 %v592_v0 }
 0x198   :  { %298 = vst.msk [vmem:[#allocation2 + $0x20] sm:$0xff] %vm30_vm8, %v297_v62  ;;  %v201_v1 = vpop.xlane.xlu0 %200 }
 0x199   :  { %v202_v2 = vmax.f32 %v197_v63, %v201_v1 }
 0x19b   :  { %203 = vst.msk [vmem:[#allocation2 + $0x10] sm:$0xff] %vm30_vm8, %v202_v2 }
 0x19c   :  { %v312_v4 = vpop.xlane.xlu0 %311 }
 0x19d   :  { %v313_v5 = vmax.f32 %v308_v3, %v312_v4 }
 0x19e   :  { %v522_v6 = vld [vmem:[#allocation2] sm:$0xff] }
 0x19f   :  { %314 = vst.msk [vmem:[#allocation2 + $0x30] sm:$0xff] %vm30_vm8, %v313_v5  ;;  %1010 = vlog2.f32 %v522_v6  ;;  %v540_v16 = vld [vmem:[#allocation2 + $0x20] sm:$0xff] }
 0x1a0   :  { %1012 = vlog2.f32 %v540_v16 }
 0x1a2   :  { %v603_v62 = vld [vmem:[#allocation2 + $0x10] sm:$0xff] }
 0x1a6   :  { %v619_v3 = vld [vmem:[#allocation2 + $0x30] sm:$0xff] }
 0x1a9   :  { %v1011_v7 = vpop.eup %1010 }
 0x1aa   :  { %v524_v9 = vmul.f32 0.6931472, %v1011_v7  ;;  %v1013_v26 = vpop.eup %1012 }
 0x1ab   :  { %v542_v31 = vmul.f32 0.6931472, %v1013_v26 }
 0x1ac   :  { %v525_v10 = vmul.f32 %v524_v9, %v1373_v8 }
 0x1ad   :  { %v543_v36 = vmul.f32 %v542_v31, %v1373_v8 }
 0x1ae   :  { %v527_v13 = vsub.f32 %v525_v10, %v526_v12 }
 0x1b0   :  { %v529_v14 = vsel %vm528_vm9, %v527_v13, 0.0 }
 0x1b1   :  { %v530_v15 = vsel %vm30_vm8, %v529_v14, 0.0 }
 0x1b2   :  { %531 = vadd.xlane.f32.xlu0 %v530_v15 }
 0x1b4   :  { %v411_v18 = vpop.xlane.xlu1 %410 }
 0x1b5   :  { %v412_v19 = vadd.f32 %v411_v18, %v403_v17 }
 0x1b7   :  { %413 = vst.msk [vmem:[#allocation2 + $0x40] sm:$0xff] %vm30_vm8, %v412_v19 }
 0x1b8   :  { %v506_v21 = vpop.xlane.xlu1 %505 }
 0x1b9   :  { %v507_v22 = vadd.f32 %v506_v21, %v500_v20 }
 0x1bb   :  { %508 = vst.msk [vmem:[#allocation2 + $0x50] sm:$0xff] %vm30_vm8, %v507_v22 }
 0x1bc   :  { %v304_v24 = vpop.xlane.xlu1 %303 }
 0x1bd   :  { %v305_v25 = vadd.f32 %v304_v24, %v300_v23 }
 0x1be   :  { %v557_v28 = vld [vmem:[#allocation2 + $0x40] sm:$0xff] }
 0x1bf   :  { %306 = vst.msk [vmem:[#allocation2 + $0x28] sm:$0xff] %vm30_vm8, %v305_v25  ;;  %1014 = vlog2.f32 %v557_v28 }
 0x1c0   :  { %v419_v29 = vpop.xlane.xlu1 %418 }
 0x1c1   :  { %v420_v30 = vadd.f32 %v419_v29, %v415_v27 }
 0x1c2   :  { %v575_v33 = vld [vmem:[#allocation2 + $0x50] sm:$0xff] }
 0x1c3   :  { %421 = vst.msk [vmem:[#allocation2 + $0x48] sm:$0xff] %vm30_vm8, %v420_v30  ;;  %1016 = vlog2.f32 %v575_v33 }
 0x1c4   :  { %v514_v34 = vpop.xlane.xlu1 %513 }
 0x1c5   :  { %v515_v35 = vadd.f32 %v514_v34, %v510_v32 }
 0x1c6   :  { %v544_v38 = vld [vmem:[#allocation2 + $0x28] sm:$0xff] }
 0x1c7   :  { %516 = vst.msk [vmem:[#allocation2 + $0x58] sm:$0xff] %vm30_vm8, %v515_v35  ;;  %v545_v39 = vsub.f32 %v543_v36, %v544_v38 }
 0x1c8   :  { %v209_v40 = vpop.xlane.xlu1 %208 }
 0x1c9   :  { %v1015_v41 = vpop.eup %1014  ;;  %v210_v42 = vmax.f32 %v205_v37, %v209_v40  ;;  %v546_v43 = vsel %vm528_vm9, %v545_v39, 0.0 }
 0x1ca   :  { %v547_v44 = vsel %vm30_vm8, %v546_v43, 0.0  ;;  %v559_v46 = vmul.f32 0.6931472, %v1015_v41  ;;  %v561_v51 = vld [vmem:[#allocation2 + $0x48] sm:$0xff] }
 0x1cb   :  { %211 = vst.msk [vmem:[#allocation2 + $0x18] sm:$0xff] %vm30_vm8, %v210_v42  ;;  %548 = vadd.xlane.f32.xlu1 %v547_v44 }
 0x1cc   :  { %v320_v47 = vpop.xlane.xlu1 %319  ;;  %v560_v48 = vmul.f32 %v559_v46, %v1365_v60 }
 0x1cd   :  { %v1017_v49 = vpop.eup %1016  ;;  %v321_v50 = vmax.f32 %v316_v45, %v320_v47 }
 0x1ce   :  { %v562_v52 = vsub.f32 %v560_v48, %v561_v51  ;;  %v577_v53 = vmul.f32 0.6931472, %v1017_v49  ;;  %v579_v58 = vld [vmem:[#allocation2 + $0x58] sm:$0xff] }
 0x1cf   :  { %322 = vst.msk [vmem:[#allocation2 + $0x38] sm:$0xff] %vm30_vm8, %v321_v50 }
 0x1d0   :  { %v564_v54 = vsel %vm563_vm10, %v562_v52, 0.0  ;;  %v578_v56 = vmul.f32 %v577_v53, %v1365_v60 }
 0x1d1   :  { %v565_v57 = vsel %vm30_vm8, %v564_v54, 0.0 }
 0x1d2   :  { %566 = vadd.xlane.f32.xlu0 %v565_v57  ;;  %v580_v59 = vsub.f32 %v578_v56, %v579_v58  ;;  %v602_v61 = vld [vmem:[#allocation2 + $0x18] sm:$0xff] }
 0x1d3   :  { %vm604_vm11 = vcmp.ge.f32.partialorder %v602_v61, %v603_v62 }
 0x1d4   :  { %v581_v63 = vsel %vm563_vm10, %v580_v59, 0.0  ;;  %vm605_vm12 = vmand %vm528_vm9, %vm604_vm11 }
 0x1d5   :  { %v582_v0 = vsel %vm30_vm8, %v581_v63, 0.0  ;;  %v675_v1 = vsel %vm605_vm12, 1.0, %v1044_v11 }
 0x1d6   :  { %583 = vadd.xlane.f32.xlu1 %v582_v0  ;;  %v618_v2 = vld [vmem:[#allocation2 + $0x38] sm:$0xff]  ;;  %v608_v60 = vsel %vm30_vm8, %v675_v1, 0.0 }
 0x1d7   :  { %vm620_vm13 = vcmp.ge.f32.partialorder %v618_v2, %v619_v3 }
 0x1d8   :  { %vm621_vm14 = vmand %vm528_vm9, %vm620_vm13 }
 0x1d9   :  { %v676_v4 = vsel %vm621_vm14, 1.0, %v1044_v11 }
 0x1da   :  { %609 = vadd.xlane.f32.xlu1 %v608_v60  ;;  %v624_v5 = vsel %vm30_vm8, %v676_v4, 0.0 }
 0x1db   :  { %625 = vadd.xlane.f32.xlu0 %v624_v5 }
 0x224   :  { %v594_v6 = vpop.xlane.xlu0 %593 }
 0x225   :  { %v595_v17 = vrot.slane %v594_v6, 4 }
 0x227   :  { %v596_v20 = vadd.f32 %v595_v17, %v594_v6 }
 0x229   :  { %v597_v25 = vrot.slane %v596_v20, 2 }
 0x22b   :  { %v598_v33 = vadd.f32 %v597_v25, %v596_v20 }
 0x22d   :  { %v599_v43 = vrot.slane %v598_v33, 1 }
 0x22f   :  { %v600_v50 = vadd.f32 %v599_v43, %v598_v33 }
 0x23f   :  { %v532_v7 = vpop.xlane.xlu0 %531 }
 0x240   :  { %v533_v9 = vrot.slane %v532_v7, 4 }
 0x242   :  { %v534_v10 = vadd.f32 %v533_v9, %v532_v7 }
 0x244   :  { %v535_v12 = vrot.slane %v534_v10, 2 }
 0x246   :  { %v536_v13 = vadd.f32 %v535_v12, %v534_v10 }
 0x248   :  { %v537_v14 = vrot.slane %v536_v13, 1 }
 0x24a   :  { %v538_v15 = vadd.f32 %v537_v14, %v536_v13 }
 0x24c   :  { %981 = vpush %v538_v15 }
 0x258   :  { %v549_v16 = vpop.xlane.xlu1 %548 }
 0x259   :  { %v550_v8 = vrot.slane %v549_v16, 4 }
 0x25b   :  { %v551_v18 = vadd.f32 %v550_v8, %v549_v16 }
 0x25d   :  { %v552_v19 = vrot.slane %v551_v18, 2 }
 0x25f   :  { %v567_v11 = vpop.xlane.xlu0 %566  ;;  %v553_v21 = vadd.f32 %v552_v19, %v551_v18 }
 0x260   :  { %v568_v22 = vrot.slane %v567_v11, 4 }
 0x261   :  { %v554_v23 = vrot.slane %v553_v21, 1 }
 0x262   :  { %v569_v24 = vadd.f32 %v568_v22, %v567_v11 }
 0x263   :  { %v584_v26 = vpop.xlane.xlu1 %583  ;;  %v555_v27 = vadd.f32 %v554_v23, %v553_v21 }
 0x264   :  { %v570_v28 = vrot.slane %v569_v24, 2  ;;  %v585_v29 = vrot.slane %v584_v26, 4 }
 0x265   :  { %983 = vpush %v555_v27 }
 0x266   :  { %v586_v30 = vadd.f32 %v585_v29, %v584_v26  ;;  %v571_v31 = vadd.f32 %v570_v28, %v569_v24 }
 0x267   :  { %v610_v32 = vpop.xlane.xlu1 %609 }
 0x268   :  { %v587_v34 = vrot.slane %v586_v30, 2  ;;  %v611_v35 = vrot.slane %v610_v32, 4  ;;  %v626_v36 = vpop.xlane.xlu0 %625  ;;  %v572_v37 = vrot.slane %v571_v31, 1 }
 0x269   :  { %v627_v38 = vrot.slane %v626_v36, 4 }
 0x26a   :  { %v612_v39 = vadd.f32 %v611_v35, %v610_v32  ;;  %v573_v40 = vadd.f32 %v572_v37, %v571_v31  ;;  %v588_v41 = vadd.f32 %v587_v34, %v586_v30 }
 0x26b   :  { %v628_v42 = vadd.f32 %v627_v38, %v626_v36 }
 0x26c   :  { %v613_v44 = vrot.slane %v612_v39, 2  ;;  %985 = vpush %v573_v40  ;;  %v589_v45 = vrot.slane %v588_v41, 1 }
 0x26d   :  { %v629_v46 = vrot.slane %v628_v42, 2 }
 0x26e   :  { %v614_v47 = vadd.f32 %v613_v44, %v612_v39  ;;  %v590_v48 = vadd.f32 %v589_v45, %v588_v41 }
 0x26f   :  { %v630_v49 = vadd.f32 %v629_v46, %v628_v42 }
 0x270   :  { %987 = vpush %v590_v48  ;;  %v615_v51 = vrot.slane %v614_v47, 1 }
 0x271   :  { %989 = vpush %v600_v50  ;;  %v631_v52 = vrot.slane %v630_v49, 1 }
 0x272   :  { %v616_v53 = vadd.f32 %v615_v51, %v614_v47 }
 0x273   :  { %v632_v54 = vadd.f32 %v631_v52, %v630_v49 }
 0x274   :  { %991 = vpush %v616_v53 }
 0x275   :  { %993 = vpush %v632_v54 }
 0x27d   :  { %s982_s1 = spop %981 }
 0x27e   :  { %v635_v56 = vstv %s982_s1 }
 0x27f   :  { %v636_v59 = vsel %vm634_vm15, %v635_v56, 0.0 }
 0x296   :  { %s984_s4 = spop %983 }
 0x297   :  { %v638_v57 = vstv %s984_s4 }
 0x298   :  { %v639_v61 = vsel %vm637_vm0, %v638_v57, %v636_v59 }
 0x29d   :  { %s986_s16 = spop %985 }
 0x29e   :  { %v641_v58 = vstv %s986_s16 }
 0x29f   :  { %v642_v62 = vsel %vm640_vm1, %v641_v58, %v639_v61 }
 0x2a1   :  { %s988_s17 = spop %987 }
 0x2a2   :  { %v644_v63 = vstv %s988_s17  ;;  %s990_s18 = spop %989 }
 0x2a3   :  { %v645_v0 = vsel %vm643_vm2, %v644_v63, %v642_v62  ;;  %v647_v1 = vstv %s990_s18 }
 0x2a4   :  { %v648_v2 = vsel %vm646_vm3, %v647_v1, %v645_v0 }
 0x2a5   :  { %s992_s21 = spop %991 }
 0x2a6   :  { %v650_v3 = vstv %s992_s21  ;;  %s994_s22 = spop %993 }
 0x2a7   :  { %v651_v60 = vsel %vm649_vm4, %v650_v3, %v648_v2  ;;  %v653_v4 = vstv %s994_s22 }
 0x2a8   :  { %v654_v5 = vsel %vm652_vm5, %v653_v4, %v651_v60 }
 0x2a9   :  { %655 = vst [vmem:[#allocation3] sm:$0xff] %v654_v5 }
 0x2aa   :  { %1029 = shalt.err (!%p1026_p4)
}
 0x2ab   :  { %s1030_s26 = scalar_lea.hbm %s1429_s6, 128 }
 0x2ac   :  { %p1031_p5 = scmp.ne.s32.totalorder %s1429_s6, %s1030_s26  ;;  %p1034_p6 = scmp.lt.u32.totalorder %s1030_s26, %s1429_s6 }
 0x2ae   :  { %p1036_p7 = pnand %p1034_p6, %p1031_p5 }
 0x2b0   :  { %1039 = shalt.err (!%p1036_p7)
}
 0x2b1   :  { %665 = dma.vmem_to_hbm [thread:$0]  %s663_s20, 128, %s1429_s6, [#allocation4]  }
 0x2b2   :  { %1040 = dma.done.wait [#allocation4], 128  }
 0x2b3   :  { %1041 = vsyncadd [#allocation4], 4294967168 }
 0x2b4   :  { %669 = vsyncpa [#allocation4], 1 }

</bundles_post_ra>
